<compile_context>
chip_gen: v6e
topology: v6e:2x2x1
jax: 0.10.0
libtpu: 0.0.40
codegen_flags: <defaults>
</compile_context>

<pallas_src>
import functools

import jax
import jax.numpy as jnp
from jax.experimental import pallas as pl
from jax.experimental.pallas import tpu as pltpu

# ---------------- config (small, consistent with the module) ----------------
DIM     = 32    # model dim (LayerNorm dim)
D_INNER = 64    # mamba expansion = 2 * DIM
D_STATE = 16
D_CONV  = 4
DT_RANK = 8
SEQ     = 8
BATCH   = 2
LN_EPS  = 1e-5  # torch.nn.LayerNorm default
LANE    = 128   # TPU lane width: kernel I/O and fused weights are padded to it

# MXU operands in bf16 (native MXU dtype on v5e/v6e/v7x); accumulation is always
# f32 via preferred_element_type and all elementwise math stays f32.
MATMUL_DTYPE = jnp.bfloat16


# ---------------- shared math (kernel body and JAX reference) ----------------
def _sigmoid(x):
    # tanh-based logistic: exact, overflow-free, lands on the EUP (no VPU divide).
    return 0.5 * (jnp.tanh(0.5 * x) + 1.0)


def _silu(x):
    return x * _sigmoid(x)


def _softplus(x):
    # numerically stable softplus
    return jnp.maximum(x, 0.0) + jnp.log(1.0 + jnp.exp(-jnp.abs(x)))


# ---------------- Pallas kernel (single invocation, whole problem in VMEM) ----------------
def _block_kernel(x_ref, ln_w_ref, ln_b_ref, w_in_ref, conv_w_ref, conv_b_ref,
                  w_x_ref, w_dt_ref, b_dt_ref, A_logT_ref, D_ref, w_out_ref,
                  o_ref,
                  conv_buf, dA_ref, dBx_ref, hall_ref,
                  *, batch, seq, dim):
    bl = batch * seq
    d_inner = w_out_ref.shape[0]
    d_state = A_logT_ref.shape[0]
    dt_rank = w_dt_ref.shape[0]
    d_conv = conv_w_ref.shape[0]
    pad_rows = conv_buf.shape[0] - bl
    mm = MATMUL_DTYPE

    # Row r = l*batch + b (l-major), lane-padded to 128.
    x = x_ref[...].astype(jnp.float32)                        # (bl, LANE)

    # ---- LayerNorm over the true model dim (pad lanes of x / ln_w / ln_b are 0,
    #      so sums over 128 lanes are exact and normed's pad lanes come out 0) ----
    inv_d = 1.0 / dim
    mu = jnp.sum(x, axis=-1, keepdims=True) * inv_d
    ex2 = jnp.sum(x * x, axis=-1, keepdims=True) * inv_d
    rstd = jax.lax.rsqrt(ex2 - mu * mu + LN_EPS)
    normed = (x - mu) * rstd * ln_w_ref[...] + ln_b_ref[...]   # (bl, LANE), 0 on pad lanes

    # ---- fused in_proj: one 128-lane-wide matmul (x|z), then slice ----
    xz = jnp.dot(normed.astype(mm), w_in_ref[...].astype(mm),
                 preferred_element_type=jnp.float32)           # (bl, 2*d_inner)
    xin = xz[:, :d_inner]
    zin = xz[:, d_inner:2 * d_inner]

    # ---- causal depthwise conv1d + SiLU ----
    # A shift of s timesteps is s*batch rows in l-major layout.  xin is written once
    # into a VMEM window with an aligned zero head; each tap is an offset load + fma.
    conv_w = conv_w_ref[...]                                   # (d_conv, d_inner)
    conv_buf[pl.ds(0, pad_rows), :] = jnp.zeros((pad_rows, d_inner), jnp.float32)
    conv_buf[pl.ds(pad_rows, bl), :] = xin
    acc = conv_b_ref[...] + xin * conv_w[d_conv - 1:d_conv, :]            # tap s = 0
    for s in range(1, d_conv):
        shifted = conv_buf[pl.ds(pad_rows - s * batch, bl), :]            # rows (l-s, b), 0 for l<s
        acc = acc + shifted * conv_w[d_conv - 1 - s:d_conv - s, :]
    x_conv = _silu(acc)                                        # (bl, d_inner)

    # ---- fused x_proj: one (d_inner, LANE) matmul -> dt_low | B | C ----
    dbc = jnp.dot(x_conv.astype(mm), w_x_ref[...].astype(mm),
                  preferred_element_type=jnp.float32)          # (bl, LANE)
    dt_low = dbc[:, :dt_rank]
    Bm = dbc[:, dt_rank:dt_rank + d_state]                     # (bl, d_state)
    Cm = dbc[:, dt_rank + d_state:dt_rank + 2 * d_state]       # (bl, d_state)
    dt = _softplus(jnp.dot(dt_low.astype(mm), w_dt_ref[...].astype(mm),
                           preferred_element_type=jnp.float32) + b_dt_ref[...])  # (bl, d_inner)

    # ---- hoisted scan coefficients (EUP exp streamed before the recurrence) ----
    A_T = -jnp.exp(A_logT_ref[...])                            # (d_state, d_inner)
    dA_ref[...] = jnp.exp(dt[:, None, :] * A_T[None, :, :])    # (bl, d_state, d_inner)
    dBx_ref[...] = (dt * x_conv)[:, None, :] * Bm[:, :, None]  # (bl, d_state, d_inner)

    # ---- selective scan, batched over B: state (batch, d_state, d_inner), L steps ----
    # Per-step body is a pure VPU fma; states go straight to scratch (no list/concat).
    h = jnp.zeros((batch, d_state, d_inner), jnp.float32)
    for l in range(seq):                                       # short, unrolled (toy L)
        r = l * batch
        h = dA_ref[pl.ds(r, batch), :, :] * h + dBx_ref[pl.ds(r, batch), :, :]
        hall_ref[pl.ds(r, batch), :, :] = h

    # ---- one batched post-scan C-contraction (VPU mul + sublane reduce) ----
    y = jnp.sum(Cm[:, :, None] * hall_ref[...], axis=1)        # (bl, d_inner)

    # ---- skip term, gating, out_proj (lane-padded), residual add, unmasked store ----
    y = (y + x_conv * D_ref[...]) * _silu(zin)
    mixer_out = jnp.dot(y.astype(mm), w_out_ref[...].astype(mm),
                        preferred_element_type=jnp.float32)    # (bl, LANE), 0 on pad lanes

    # hidden_states = LN(x) + drop_path(mixer(LN(x))); drop_path is identity (rate 0.0)
    o_ref[...] = (normed + mixer_out).astype(o_ref.dtype)


def block_forward(x, params, reverse=False):
    """Pallas Block forward.  x: (B, L, D).  Returns (hidden_states, None)."""
    B, L, D = x.shape
    if reverse:
        x = jnp.flip(x, axis=1)

    # ---- wrapper-side layout / parameter plumbing (no per-token compute) ----
    # Rows are l-major (r = l*B + b): the causal shift is s*B rows and each scan step
    # touches a contiguous row block; works for any L (no power-of-two requirement).
    x_lb = jnp.transpose(x, (1, 0, 2)).reshape(L * B, D)
    x_pad = jnp.pad(x_lb, ((0, 0), (0, LANE - D)))             # lane-dense input slab

    ln_w = jnp.pad(params["ln_w"], ((0, 0), (0, LANE - D)))    # zero pad -> normed pad lanes = 0
    ln_b = jnp.pad(params["ln_b"], ((0, 0), (0, LANE - D)))
    w_in = jnp.concatenate([params["w_in_x"], params["w_in_z"]], axis=1)   # (D, 2*D_INNER)
    w_in = jnp.pad(w_in, ((0, LANE - D), (0, 0)))                          # (LANE, 2*D_INNER)
    w_x = jnp.concatenate([params["w_x_dt"], params["w_x_B"], params["w_x_C"]], axis=1)
    w_x = jnp.pad(w_x, ((0, 0), (0, LANE - w_x.shape[1])))                 # (D_INNER, LANE)
    w_out = jnp.pad(params["w_out"], ((0, 0), (0, LANE - D)))              # (D_INNER, LANE)
    A_logT = params["A_log"].T                                              # (D_STATE, D_INNER)

    bl = B * L
    pad_rows = ((D_CONV - 1) * B + 7) // 8 * 8                 # aligned zero head for the conv window

    kernel = functools.partial(_block_kernel, batch=B, seq=L, dim=D)
    n_inputs = 12
    out2d = pl.pallas_call(
        kernel,
        out_shape=jax.ShapeDtypeStruct((bl, LANE), x.dtype),
        in_specs=[pl.BlockSpec(memory_space=pltpu.MemorySpace.VMEM)] * n_inputs,
        out_specs=pl.BlockSpec(memory_space=pltpu.MemorySpace.VMEM),
        scratch_shapes=[
            pltpu.VMEM((pad_rows + bl, D_INNER), jnp.float32),   # conv shift window
            pltpu.VMEM((bl, D_STATE, D_INNER), jnp.float32),     # dA  = exp(dt * A), hoisted
            pltpu.VMEM((bl, D_STATE, D_INNER), jnp.float32),     # dBx = dt * x * B, hoisted
            pltpu.VMEM((bl, D_STATE, D_INNER), jnp.float32),     # per-step scan states
        ],
    )(x_pad, ln_w, ln_b, w_in, params["conv_w"], params["conv_b"],
      w_x, params["w_dt"], params["b_dt"], A_logT, params["D"], w_out)

    out = out2d[:, :D].reshape(L, B, D).transpose(1, 0, 2)
    if reverse:
        out = jnp.flip(out, axis=1)
    return out, None


# ---------------- pure-JAX reference (clear per-sample formulation) ----------------
def _block_ref_single(x, p):
    """Reference Block forward for one batch element. x: (L, D) float32."""
    L, _ = x.shape
    mu = jnp.mean(x, axis=-1, keepdims=True)
    var = jnp.mean((x - mu) ** 2, axis=-1, keepdims=True)
    normed = (x - mu) * jax.lax.rsqrt(var + LN_EPS) * p["ln_w"] + p["ln_b"]

    xin = normed @ p["w_in_x"]
    zin = normed @ p["w_in_z"]

    acc = p["conv_b"]
    for k in range(D_CONV):
        shift = D_CONV - 1 - k
        xs = xin if shift == 0 else jnp.concatenate(
            [jnp.zeros((shift, D_INNER), xin.dtype), xin[:L - shift]], axis=0)
        acc = acc + xs * p["conv_w"][k:k + 1, :]
    x_conv = _silu(acc)

    dt_low = x_conv @ p["w_x_dt"]
    Bm = x_conv @ p["w_x_B"]
    Cm = x_conv @ p["w_x_C"]
    dt = _softplus(dt_low @ p["w_dt"] + p["b_dt"])

    A = -jnp.exp(p["A_log"])
    h = jnp.zeros((D_INNER, D_STATE), jnp.float32)
    ys = []
    for l in range(L):
        h = jnp.exp(dt[l][:, None] * A) * h \
            + dt[l][:, None] * Bm[l][None, :] * x_conv[l][:, None]
        ys.append(jnp.sum(h * Cm[l][None, :], axis=-1))
    y = jnp.stack(ys, axis=0) + x_conv * p["D"]
    y = y * _silu(zin)
    return normed + y @ p["w_out"]


def _ref_forward(x, params, reverse=False):
    if reverse:
        x = jnp.flip(x, axis=1)
    out = jax.vmap(lambda xb: _block_ref_single(xb.astype(jnp.float32), params))(x)
    if reverse:
        out = jnp.flip(out, axis=1)
    return out


# ---------------- deterministic parameter init ----------------
def init_params(key):
    ks = jax.random.split(key, 12)
    sc = 0.02
    p = {}
    p["ln_w"]   = 1.0 + 0.1 * jax.random.normal(ks[0], (1, DIM), jnp.float32)
    p["ln_b"]   = 0.1 * jax.random.normal(ks[1], (1, DIM), jnp.float32)
    p["w_in_x"] = jax.random.normal(ks[2], (DIM, D_INNER), jnp.float32) * sc
    p["w_in_z"] = jax.random.normal(ks[3], (DIM, D_INNER), jnp.float32) * sc
    p["conv_w"] = jax.random.normal(ks[4], (D_CONV, D_INNER), jnp.float32) * sc
    p["conv_b"] = 0.1 * jax.random.normal(ks[5], (1, D_INNER), jnp.float32)
    p["w_x_dt"] = jax.random.normal(ks[6], (D_INNER, DT_RANK), jnp.float32) * sc
    p["w_x_B"]  = jax.random.normal(ks[7], (D_INNER, D_STATE), jnp.float32) * sc
    p["w_x_C"]  = jax.random.normal(ks[8], (D_INNER, D_STATE), jnp.float32) * sc
    p["w_dt"]   = jax.random.normal(ks[9], (DT_RANK, D_INNER), jnp.float32) * sc
    p["b_dt"]   = 0.1 * jax.random.normal(ks[10], (1, D_INNER), jnp.float32)
    p["A_log"]  = jnp.log(jnp.broadcast_to(
        jnp.arange(1, D_STATE + 1, dtype=jnp.float32)[None, :], (D_INNER, D_STATE)))
    p["D"]      = 1.0 + 0.1 * jax.random.normal(ks[11], (1, D_INNER), jnp.float32)
    p["w_out"]  = jax.random.normal(jax.random.fold_in(ks[11], 1),
                                    (D_INNER, DIM), jnp.float32) * sc
    return p


if __name__ == "__main__":
    key = jax.random.PRNGKey(0)
    kx, kp = jax.random.split(key)
    params = init_params(kp)
    x = jax.random.normal(kx, (BATCH, SEQ, DIM), jnp.float32)

    # forward path
    out, _ = block_forward(x, params)
    out = jax.block_until_ready(out)
    ref = jax.block_until_ready(_ref_forward(x, params))
    assert out.shape == (BATCH, SEQ, DIM)
    err = float(jnp.max(jnp.abs(out - ref)))
    # bf16 MXU operands (f32 accumulation) vs. pure-f32 reference -> 1e-3 tolerance.
    assert jnp.allclose(out, ref, atol=1e-3, rtol=1e-3), f"max abs err = {err}"

    # reverse path (glue flips around the same kernel)
    out_r, _ = block_forward(x, params, reverse=True)
    out_r = jax.block_until_ready(out_r)
    ref_r = jax.block_until_ready(_ref_forward(x, params, reverse=True))
    err_r = float(jnp.max(jnp.abs(out_r - ref_r)))
    assert jnp.allclose(out_r, ref_r, atol=1e-3, rtol=1e-3), f"max abs err (reverse) = {err_r}"

    print("KERNEL_OK")
</pallas_src>

<mosaic_0001>
module attributes {stable_mosaic.version = 11 : i64} {
  func.func @_block_kernel(%arg0: memref<16x128xf32, #tpu.memory_space<vmem>>, %arg1: memref<1x128xf32, #tpu.memory_space<vmem>>, %arg2: memref<1x128xf32, #tpu.memory_space<vmem>>, %arg3: memref<128x128xf32, #tpu.memory_space<vmem>>, %arg4: memref<4x64xf32, #tpu.memory_space<vmem>>, %arg5: memref<1x64xf32, #tpu.memory_space<vmem>>, %arg6: memref<64x128xf32, #tpu.memory_space<vmem>>, %arg7: memref<8x64xf32, #tpu.memory_space<vmem>>, %arg8: memref<1x64xf32, #tpu.memory_space<vmem>>, %arg9: memref<16x64xf32, #tpu.memory_space<vmem>>, %arg10: memref<1x64xf32, #tpu.memory_space<vmem>>, %arg11: memref<64x128xf32, #tpu.memory_space<vmem>>, %arg12: memref<16x128xf32, #tpu.memory_space<vmem>>, %arg13: memref<24x64xf32, #tpu.memory_space<vmem>>, %arg14: memref<16x16x64xf32, #tpu.memory_space<vmem>>, %arg15: memref<16x16x64xf32, #tpu.memory_space<vmem>>, %arg16: memref<16x16x64xf32, #tpu.memory_space<vmem>>) attributes {dimension_semantics = [], scalar_prefetch = 0 : i64, scratch_operands = 4 : i64, tpu.core_type = #tpu.core_type<tc>} {
    %c0 = arith.constant 0 : index
    %c0_0 = arith.constant 0 : index
    %0 = vector.load %arg0[%c0, %c0_0] : memref<16x128xf32, #tpu.memory_space<vmem>>, vector<16x128xf32>
    %cst = arith.constant dense<0.000000e+00> : vector<16xf32>
    %1 = vector.multi_reduction <add>, %0, %cst [1] : vector<16x128xf32> to vector<16xf32>
    %2 = vector.shape_cast %1 : vector<16xf32> to vector<16x1xf32>
    %cst_1 = arith.constant 3.125000e-02 : f32
    %3 = vector.broadcast %cst_1 : f32 to vector<16x1xf32>
    %4 = arith.mulf %2, %3 : vector<16x1xf32>
    %5 = arith.mulf %0, %0 : vector<16x128xf32>
    %cst_2 = arith.constant dense<0.000000e+00> : vector<16xf32>
    %6 = vector.multi_reduction <add>, %5, %cst_2 [1] : vector<16x128xf32> to vector<16xf32>
    %7 = vector.shape_cast %6 : vector<16xf32> to vector<16x1xf32>
    %cst_3 = arith.constant 3.125000e-02 : f32
    %8 = vector.broadcast %cst_3 : f32 to vector<16x1xf32>
    %9 = arith.mulf %7, %8 : vector<16x1xf32>
    %10 = arith.mulf %4, %4 : vector<16x1xf32>
    %11 = arith.subf %9, %10 : vector<16x1xf32>
    %cst_4 = arith.constant 9.99999974E-6 : f32
    %12 = vector.broadcast %cst_4 : f32 to vector<16x1xf32>
    %13 = arith.addf %11, %12 : vector<16x1xf32>
    %14 = math.rsqrt %13 : vector<16x1xf32>
    %15 = vector.broadcast %4 : vector<16x1xf32> to vector<16x128xf32>
    %16 = arith.subf %0, %15 : vector<16x128xf32>
    %17 = vector.broadcast %14 : vector<16x1xf32> to vector<16x128xf32>
    %18 = arith.mulf %16, %17 : vector<16x128xf32>
    %c0_5 = arith.constant 0 : index
    %c0_6 = arith.constant 0 : index
    %19 = vector.load %arg1[%c0_5, %c0_6] : memref<1x128xf32, #tpu.memory_space<vmem>>, vector<1x128xf32>
    %20 = vector.broadcast %19 : vector<1x128xf32> to vector<16x128xf32>
    %21 = arith.mulf %18, %20 : vector<16x128xf32>
    %c0_7 = arith.constant 0 : index
    %c0_8 = arith.constant 0 : index
    %22 = vector.load %arg2[%c0_7, %c0_8] : memref<1x128xf32, #tpu.memory_space<vmem>>, vector<1x128xf32>
    %23 = vector.broadcast %22 : vector<1x128xf32> to vector<16x128xf32>
    %24 = arith.addf %21, %23 : vector<16x128xf32>
    %25 = arith.truncf %24 : vector<16x128xf32> to vector<16x128xbf16>
    %c0_9 = arith.constant 0 : index
    %c0_10 = arith.constant 0 : index
    %26 = vector.load %arg3[%c0_9, %c0_10] : memref<128x128xf32, #tpu.memory_space<vmem>>, vector<128x128xf32>
    %27 = arith.truncf %26 : vector<128x128xf32> to vector<128x128xbf16>
    %cst_11 = arith.constant dense<0.000000e+00> : vector<16x128xf32>
    %28 = tpu.matmul %25, %27, %cst_11 {dimension_numbers = #tpu.dot_dimension_numbers<[1], [0], [0], [1], [0, 0, 1, 1], [], []>} : vector<16x128xbf16>, vector<128x128xbf16>, vector<16x128xf32> -> vector<16x128xf32>
    %29 = vector.extract_strided_slice %28 {offsets = [0, 0], sizes = [16, 64], strides = [1, 1]} : vector<16x128xf32> to vector<16x64xf32>
    %30 = vector.extract_strided_slice %28 {offsets = [0, 64], sizes = [16, 64], strides = [1, 1]} : vector<16x128xf32> to vector<16x64xf32>
    %c0_12 = arith.constant 0 : index
    %c0_13 = arith.constant 0 : index
    %31 = vector.load %arg4[%c0_12, %c0_13] : memref<4x64xf32, #tpu.memory_space<vmem>>, vector<4x64xf32>
    %cst_14 = arith.constant 0.000000e+00 : f32
    %32 = vector.broadcast %cst_14 : f32 to vector<8x64xf32>
    %c0_15 = arith.constant 0 : index
    %c0_16 = arith.constant 0 : index
    %33 = vector.load %arg13[%c0_15, %c0_16] : memref<24x64xf32, #tpu.memory_space<vmem>>, vector<8x64xf32>
    tpu.vector_store %arg13[%c0_15, %c0_16], %32 {strides = array<i32>} : memref<24x64xf32, #tpu.memory_space<vmem>>, vector<8x64xf32>,
    %c8 = arith.constant 8 : index
    %c0_17 = arith.constant 0 : index
    %34 = vector.load %arg13[%c8, %c0_17] : memref<24x64xf32, #tpu.memory_space<vmem>>, vector<16x64xf32>
    tpu.vector_store %arg13[%c8, %c0_17], %29 {strides = array<i32>} : memref<24x64xf32, #tpu.memory_space<vmem>>, vector<16x64xf32>,
    %c0_18 = arith.constant 0 : index
    %c0_19 = arith.constant 0 : index
    %35 = vector.load %arg5[%c0_18, %c0_19] : memref<1x64xf32, #tpu.memory_space<vmem>>, vector<1x64xf32>
    %36 = vector.extract_strided_slice %31 {offsets = [3, 0], sizes = [1, 64], strides = [1, 1]} : vector<4x64xf32> to vector<1x64xf32>
    %37 = vector.broadcast %36 : vector<1x64xf32> to vector<16x64xf32>
    %38 = arith.mulf %29, %37 : vector<16x64xf32>
    %39 = vector.broadcast %35 : vector<1x64xf32> to vector<16x64xf32>
    %40 = arith.addf %39, %38 : vector<16x64xf32>
    %c6 = arith.constant 6 : index
    %c0_20 = arith.constant 0 : index
    %41 = vector.load %arg13[%c6, %c0_20] : memref<24x64xf32, #tpu.memory_space<vmem>>, vector<16x64xf32>
    %42 = vector.extract_strided_slice %31 {offsets = [2, 0], sizes = [1, 64], strides = [1, 1]} : vector<4x64xf32> to vector<1x64xf32>
    %43 = vector.broadcast %42 : vector<1x64xf32> to vector<16x64xf32>
    %44 = arith.mulf %41, %43 : vector<16x64xf32>
    %45 = arith.addf %40, %44 : vector<16x64xf32>
    %c4 = arith.constant 4 : index
    %c0_21 = arith.constant 0 : index
    %46 = vector.load %arg13[%c4, %c0_21] : memref<24x64xf32, #tpu.memory_space<vmem>>, vector<16x64xf32>
    %47 = vector.extract_strided_slice %31 {offsets = [1, 0], sizes = [1, 64], strides = [1, 1]} : vector<4x64xf32> to vector<1x64xf32>
    %48 = vector.broadcast %47 : vector<1x64xf32> to vector<16x64xf32>
    %49 = arith.mulf %46, %48 : vector<16x64xf32>
    %50 = arith.addf %45, %49 : vector<16x64xf32>
    %c2 = arith.constant 2 : index
    %c0_22 = arith.constant 0 : index
    %51 = vector.load %arg13[%c2, %c0_22] : memref<24x64xf32, #tpu.memory_space<vmem>>, vector<16x64xf32>
    %52 = vector.extract_strided_slice %31 {offsets = [0, 0], sizes = [1, 64], strides = [1, 1]} : vector<4x64xf32> to vector<1x64xf32>
    %53 = vector.broadcast %52 : vector<1x64xf32> to vector<16x64xf32>
    %54 = arith.mulf %51, %53 : vector<16x64xf32>
    %55 = arith.addf %50, %54 : vector<16x64xf32>
    %cst_23 = arith.constant 5.000000e-01 : f32
    %56 = vector.broadcast %cst_23 : f32 to vector<16x64xf32>
    %57 = arith.mulf %56, %55 : vector<16x64xf32>
    %58 = math.tanh %57 : vector<16x64xf32>
    %cst_24 = arith.constant 1.000000e+00 : f32
    %59 = vector.broadcast %cst_24 : f32 to vector<16x64xf32>
    %60 = arith.addf %58, %59 : vector<16x64xf32>
    %cst_25 = arith.constant 5.000000e-01 : f32
    %61 = vector.broadcast %cst_25 : f32 to vector<16x64xf32>
    %62 = arith.mulf %61, %60 : vector<16x64xf32>
    %63 = arith.mulf %55, %62 : vector<16x64xf32>
    %64 = arith.truncf %63 : vector<16x64xf32> to vector<16x64xbf16>
    %c0_26 = arith.constant 0 : index
    %c0_27 = arith.constant 0 : index
    %65 = vector.load %arg6[%c0_26, %c0_27] : memref<64x128xf32, #tpu.memory_space<vmem>>, vector<64x128xf32>
    %66 = arith.truncf %65 : vector<64x128xf32> to vector<64x128xbf16>
    %cst_28 = arith.constant dense<0.000000e+00> : vector<16x128xf32>
    %67 = tpu.matmul %64, %66, %cst_28 {dimension_numbers = #tpu.dot_dimension_numbers<[1], [0], [0], [1], [0, 0, 1, 1], [], []>} : vector<16x64xbf16>, vector<64x128xbf16>, vector<16x128xf32> -> vector<16x128xf32>
    %68 = vector.extract_strided_slice %67 {offsets = [0, 0], sizes = [16, 8], strides = [1, 1]} : vector<16x128xf32> to vector<16x8xf32>
    %69 = vector.extract_strided_slice %67 {offsets = [0, 8], sizes = [16, 16], strides = [1, 1]} : vector<16x128xf32> to vector<16x16xf32>
    %70 = vector.extract_strided_slice %67 {offsets = [0, 24], sizes = [16, 16], strides = [1, 1]} : vector<16x128xf32> to vector<16x16xf32>
    %71 = arith.truncf %68 : vector<16x8xf32> to vector<16x8xbf16>
    %c0_29 = arith.constant 0 : index
    %c0_30 = arith.constant 0 : index
    %72 = vector.load %arg7[%c0_29, %c0_30] : memref<8x64xf32, #tpu.memory_space<vmem>>, vector<8x64xf32>
    %73 = arith.truncf %72 : vector<8x64xf32> to vector<8x64xbf16>
    %cst_31 = arith.constant dense<0.000000e+00> : vector<16x64xf32>
    %74 = tpu.matmul %71, %73, %cst_31 {dimension_numbers = #tpu.dot_dimension_numbers<[1], [0], [0], [1], [0, 0, 1, 1], [], []>} : vector<16x8xbf16>, vector<8x64xbf16>, vector<16x64xf32> -> vector<16x64xf32>
    %c0_32 = arith.constant 0 : index
    %c0_33 = arith.constant 0 : index
    %75 = vector.load %arg8[%c0_32, %c0_33] : memref<1x64xf32, #tpu.memory_space<vmem>>, vector<1x64xf32>
    %76 = vector.broadcast %75 : vector<1x64xf32> to vector<16x64xf32>
    %77 = arith.addf %74, %76 : vector<16x64xf32>
    %cst_34 = arith.constant 0.000000e+00 : f32
    %78 = vector.broadcast %cst_34 : f32 to vector<16x64xf32>
    %79 = arith.maximumf %77, %78 : vector<16x64xf32>
    %80 = math.absf %77 : vector<16x64xf32>
    %cst_35 = arith.constant 0.000000e+00 : f32
    %81 = vector.broadcast %cst_35 : f32 to vector<16x64xf32>
    %82 = arith.subf %81, %80 : vector<16x64xf32>
    %83 = math.exp %82 : vector<16x64xf32>
    %cst_36 = arith.constant 1.000000e+00 : f32
    %84 = vector.broadcast %cst_36 : f32 to vector<16x64xf32>
    %85 = arith.addf %84, %83 : vector<16x64xf32>
    %86 = math.log %85 : vector<16x64xf32>
    %87 = arith.addf %79, %86 : vector<16x64xf32>
    %c0_37 = arith.constant 0 : index
    %c0_38 = arith.constant 0 : index
    %88 = vector.load %arg9[%c0_37, %c0_38] : memref<16x64xf32, #tpu.memory_space<vmem>>, vector<16x64xf32>
    %89 = math.exp %88 : vector<16x64xf32>
    %cst_39 = arith.constant 0.000000e+00 : f32
    %90 = vector.broadcast %cst_39 : f32 to vector<16x64xf32>
    %91 = arith.subf %90, %89 : vector<16x64xf32>
    %92 = vector.shape_cast %87 : vector<16x64xf32> to vector<16x1x64xf32>
    %93 = vector.shape_cast %91 : vector<16x64xf32> to vector<1x16x64xf32>
    %94 = vector.broadcast %92 : vector<16x1x64xf32> to vector<16x16x64xf32>
    %95 = vector.broadcast %93 : vector<1x16x64xf32> to vector<16x16x64xf32>
    %96 = arith.mulf %94, %95 : vector<16x16x64xf32>
    %97 = math.exp %96 : vector<16x16x64xf32>
    %c0_40 = arith.constant 0 : index
    %c0_41 = arith.constant 0 : index
    %c0_42 = arith.constant 0 : index
    %98 = vector.load %arg14[%c0_40, %c0_41, %c0_42] : memref<16x16x64xf32, #tpu.memory_space<vmem>>, vector<16x16x64xf32>
    tpu.vector_store %arg14[%c0_40, %c0_41, %c0_42], %97 {strides = array<i32>} : memref<16x16x64xf32, #tpu.memory_space<vmem>>, vector<16x16x64xf32>,
    %99 = arith.mulf %87, %63 : vector<16x64xf32>
    %100 = vector.shape_cast %99 : vector<16x64xf32> to vector<16x1x64xf32>
    %101 = vector.shape_cast %69 : vector<16x16xf32> to vector<16x16x1xf32>
    %102 = vector.broadcast %100 : vector<16x1x64xf32> to vector<16x16x64xf32>
    %103 = vector.broadcast %101 : vector<16x16x1xf32> to vector<16x16x64xf32>
    %104 = arith.mulf %102, %103 : vector<16x16x64xf32>
    %c0_43 = arith.constant 0 : index
    %c0_44 = arith.constant 0 : index
    %c0_45 = arith.constant 0 : index
    %105 = vector.load %arg15[%c0_43, %c0_44, %c0_45] : memref<16x16x64xf32, #tpu.memory_space<vmem>>, vector<16x16x64xf32>
    tpu.vector_store %arg15[%c0_43, %c0_44, %c0_45], %104 {strides = array<i32>} : memref<16x16x64xf32, #tpu.memory_space<vmem>>, vector<16x16x64xf32>,
    %cst_46 = arith.constant 0.000000e+00 : f32
    %106 = vector.broadcast %cst_46 : f32 to vector<2x16x64xf32>
    %c0_47 = arith.constant 0 : index
    %c0_48 = arith.constant 0 : index
    %c0_49 = arith.constant 0 : index
    %107 = vector.load %arg14[%c0_47, %c0_48, %c0_49] : memref<16x16x64xf32, #tpu.memory_space<vmem>>, vector<2x16x64xf32>
    %108 = arith.mulf %107, %106 : vector<2x16x64xf32>
    %c0_50 = arith.constant 0 : index
    %c0_51 = arith.constant 0 : index
    %c0_52 = arith.constant 0 : index
    %109 = vector.load %arg15[%c0_50, %c0_51, %c0_52] : memref<16x16x64xf32, #tpu.memory_space<vmem>>, vector<2x16x64xf32>
    %110 = arith.addf %108, %109 : vector<2x16x64xf32>
    %c0_53 = arith.constant 0 : index
    %c0_54 = arith.constant 0 : index
    %c0_55 = arith.constant 0 : index
    %111 = vector.load %arg16[%c0_53, %c0_54, %c0_55] : memref<16x16x64xf32, #tpu.memory_space<vmem>>, vector<2x16x64xf32>
    tpu.vector_store %arg16[%c0_53, %c0_54, %c0_55], %110 {strides = array<i32>} : memref<16x16x64xf32, #tpu.memory_space<vmem>>, vector<2x16x64xf32>,
    %c2_56 = arith.constant 2 : index
    %c0_57 = arith.constant 0 : index
    %c0_58 = arith.constant 0 : index
    %112 = vector.load %arg14[%c2_56, %c0_57, %c0_58] : memref<16x16x64xf32, #tpu.memory_space<vmem>>, vector<2x16x64xf32>
    %113 = arith.mulf %112, %110 : vector<2x16x64xf32>
    %c2_59 = arith.constant 2 : index
    %c0_60 = arith.constant 0 : index
    %c0_61 = arith.constant 0 : index
    %114 = vector.load %arg15[%c2_59, %c0_60, %c0_61] : memref<16x16x64xf32, #tpu.memory_space<vmem>>, vector<2x16x64xf32>
    %115 = arith.addf %113, %114 : vector<2x16x64xf32>
    %c2_62 = arith.constant 2 : index
    %c0_63 = arith.constant 0 : index
    %c0_64 = arith.constant 0 : index
    %116 = vector.load %arg16[%c2_62, %c0_63, %c0_64] : memref<16x16x64xf32, #tpu.memory_space<vmem>>, vector<2x16x64xf32>
    tpu.vector_store %arg16[%c2_62, %c0_63, %c0_64], %115 {strides = array<i32>} : memref<16x16x64xf32, #tpu.memory_space<vmem>>, vector<2x16x64xf32>,
    %c4_65 = arith.constant 4 : index
    %c0_66 = arith.constant 0 : index
    %c0_67 = arith.constant 0 : index
    %117 = vector.load %arg14[%c4_65, %c0_66, %c0_67] : memref<16x16x64xf32, #tpu.memory_space<vmem>>, vector<2x16x64xf32>
    %118 = arith.mulf %117, %115 : vector<2x16x64xf32>
    %c4_68 = arith.constant 4 : index
    %c0_69 = arith.constant 0 : index
    %c0_70 = arith.constant 0 : index
    %119 = vector.load %arg15[%c4_68, %c0_69, %c0_70] : memref<16x16x64xf32, #tpu.memory_space<vmem>>, vector<2x16x64xf32>
    %120 = arith.addf %118, %119 : vector<2x16x64xf32>
    %c4_71 = arith.constant 4 : index
    %c0_72 = arith.constant 0 : index
    %c0_73 = arith.constant 0 : index
    %121 = vector.load %arg16[%c4_71, %c0_72, %c0_73] : memref<16x16x64xf32, #tpu.memory_space<vmem>>, vector<2x16x64xf32>
    tpu.vector_store %arg16[%c4_71, %c0_72, %c0_73], %120 {strides = array<i32>} : memref<16x16x64xf32, #tpu.memory_space<vmem>>, vector<2x16x64xf32>,
    %c6_74 = arith.constant 6 : index
    %c0_75 = arith.constant 0 : index
    %c0_76 = arith.constant 0 : index
    %122 = vector.load %arg14[%c6_74, %c0_75, %c0_76] : memref<16x16x64xf32, #tpu.memory_space<vmem>>, vector<2x16x64xf32>
    %123 = arith.mulf %122, %120 : vector<2x16x64xf32>
    %c6_77 = arith.constant 6 : index
    %c0_78 = arith.constant 0 : index
    %c0_79 = arith.constant 0 : index
    %124 = vector.load %arg15[%c6_77, %c0_78, %c0_79] : memref<16x16x64xf32, #tpu.memory_space<vmem>>, vector<2x16x64xf32>
    %125 = arith.addf %123, %124 : vector<2x16x64xf32>
    %c6_80 = arith.constant 6 : index
    %c0_81 = arith.constant 0 : index
    %c0_82 = arith.constant 0 : index
    %126 = vector.load %arg16[%c6_80, %c0_81, %c0_82] : memref<16x16x64xf32, #tpu.memory_space<vmem>>, vector<2x16x64xf32>
    tpu.vector_store %arg16[%c6_80, %c0_81, %c0_82], %125 {strides = array<i32>} : memref<16x16x64xf32, #tpu.memory_space<vmem>>, vector<2x16x64xf32>,
    %c8_83 = arith.constant 8 : index
    %c0_84 = arith.constant 0 : index
    %c0_85 = arith.constant 0 : index
    %127 = vector.load %arg14[%c8_83, %c0_84, %c0_85] : memref<16x16x64xf32, #tpu.memory_space<vmem>>, vector<2x16x64xf32>
    %128 = arith.mulf %127, %125 : vector<2x16x64xf32>
    %c8_86 = arith.constant 8 : index
    %c0_87 = arith.constant 0 : index
    %c0_88 = arith.constant 0 : index
    %129 = vector.load %arg15[%c8_86, %c0_87, %c0_88] : memref<16x16x64xf32, #tpu.memory_space<vmem>>, vector<2x16x64xf32>
    %130 = arith.addf %128, %129 : vector<2x16x64xf32>
    %c8_89 = arith.constant 8 : index
    %c0_90 = arith.constant 0 : index
    %c0_91 = arith.constant 0 : index
    %131 = vector.load %arg16[%c8_89, %c0_90, %c0_91] : memref<16x16x64xf32, #tpu.memory_space<vmem>>, vector<2x16x64xf32>
    tpu.vector_store %arg16[%c8_89, %c0_90, %c0_91], %130 {strides = array<i32>} : memref<16x16x64xf32, #tpu.memory_space<vmem>>, vector<2x16x64xf32>,
    %c10 = arith.constant 10 : index
    %c0_92 = arith.constant 0 : index
    %c0_93 = arith.constant 0 : index
    %132 = vector.load %arg14[%c10, %c0_92, %c0_93] : memref<16x16x64xf32, #tpu.memory_space<vmem>>, vector<2x16x64xf32>
    %133 = arith.mulf %132, %130 : vector<2x16x64xf32>
    %c10_94 = arith.constant 10 : index
    %c0_95 = arith.constant 0 : index
    %c0_96 = arith.constant 0 : index
    %134 = vector.load %arg15[%c10_94, %c0_95, %c0_96] : memref<16x16x64xf32, #tpu.memory_space<vmem>>, vector<2x16x64xf32>
    %135 = arith.addf %133, %134 : vector<2x16x64xf32>
    %c10_97 = arith.constant 10 : index
    %c0_98 = arith.constant 0 : index
    %c0_99 = arith.constant 0 : index
    %136 = vector.load %arg16[%c10_97, %c0_98, %c0_99] : memref<16x16x64xf32, #tpu.memory_space<vmem>>, vector<2x16x64xf32>
    tpu.vector_store %arg16[%c10_97, %c0_98, %c0_99], %135 {strides = array<i32>} : memref<16x16x64xf32, #tpu.memory_space<vmem>>, vector<2x16x64xf32>,
    %c12 = arith.constant 12 : index
    %c0_100 = arith.constant 0 : index
    %c0_101 = arith.constant 0 : index
    %137 = vector.load %arg14[%c12, %c0_100, %c0_101] : memref<16x16x64xf32, #tpu.memory_space<vmem>>, vector<2x16x64xf32>
    %138 = arith.mulf %137, %135 : vector<2x16x64xf32>
    %c12_102 = arith.constant 12 : index
    %c0_103 = arith.constant 0 : index
    %c0_104 = arith.constant 0 : index
    %139 = vector.load %arg15[%c12_102, %c0_103, %c0_104] : memref<16x16x64xf32, #tpu.memory_space<vmem>>, vector<2x16x64xf32>
    %140 = arith.addf %138, %139 : vector<2x16x64xf32>
    %c12_105 = arith.constant 12 : index
    %c0_106 = arith.constant 0 : index
    %c0_107 = arith.constant 0 : index
    %141 = vector.load %arg16[%c12_105, %c0_106, %c0_107] : memref<16x16x64xf32, #tpu.memory_space<vmem>>, vector<2x16x64xf32>
    tpu.vector_store %arg16[%c12_105, %c0_106, %c0_107], %140 {strides = array<i32>} : memref<16x16x64xf32, #tpu.memory_space<vmem>>, vector<2x16x64xf32>,
    %c14 = arith.constant 14 : index
    %c0_108 = arith.constant 0 : index
    %c0_109 = arith.constant 0 : index
    %142 = vector.load %arg14[%c14, %c0_108, %c0_109] : memref<16x16x64xf32, #tpu.memory_space<vmem>>, vector<2x16x64xf32>
    %143 = arith.mulf %142, %140 : vector<2x16x64xf32>
    %c14_110 = arith.constant 14 : index
    %c0_111 = arith.constant 0 : index
    %c0_112 = arith.constant 0 : index
    %144 = vector.load %arg15[%c14_110, %c0_111, %c0_112] : memref<16x16x64xf32, #tpu.memory_space<vmem>>, vector<2x16x64xf32>
    %145 = arith.addf %143, %144 : vector<2x16x64xf32>
    %c14_113 = arith.constant 14 : index
    %c0_114 = arith.constant 0 : index
    %c0_115 = arith.constant 0 : index
    %146 = vector.load %arg16[%c14_113, %c0_114, %c0_115] : memref<16x16x64xf32, #tpu.memory_space<vmem>>, vector<2x16x64xf32>
    tpu.vector_store %arg16[%c14_113, %c0_114, %c0_115], %145 {strides = array<i32>} : memref<16x16x64xf32, #tpu.memory_space<vmem>>, vector<2x16x64xf32>,
    %147 = vector.shape_cast %70 : vector<16x16xf32> to vector<16x16x1xf32>
    %c0_116 = arith.constant 0 : index
    %c0_117 = arith.constant 0 : index
    %c0_118 = arith.constant 0 : index
    %148 = vector.load %arg16[%c0_116, %c0_117, %c0_118] : memref<16x16x64xf32, #tpu.memory_space<vmem>>, vector<16x16x64xf32>
    %149 = vector.broadcast %147 : vector<16x16x1xf32> to vector<16x16x64xf32>
    %150 = arith.mulf %149, %148 : vector<16x16x64xf32>
    %cst_119 = arith.constant dense<0.000000e+00> : vector<16x64xf32>
    %151 = vector.multi_reduction <add>, %150, %cst_119 [1] : vector<16x16x64xf32> to vector<16x64xf32>
    %c0_120 = arith.constant 0 : index
    %c0_121 = arith.constant 0 : index
    %152 = vector.load %arg10[%c0_120, %c0_121] : memref<1x64xf32, #tpu.memory_space<vmem>>, vector<1x64xf32>
    %153 = vector.broadcast %152 : vector<1x64xf32> to vector<16x64xf32>
    %154 = arith.mulf %63, %153 : vector<16x64xf32>
    %155 = arith.addf %151, %154 : vector<16x64xf32>
    %cst_122 = arith.constant 5.000000e-01 : f32
    %156 = vector.broadcast %cst_122 : f32 to vector<16x64xf32>
    %157 = arith.mulf %156, %30 : vector<16x64xf32>
    %158 = math.tanh %157 : vector<16x64xf32>
    %cst_123 = arith.constant 1.000000e+00 : f32
    %159 = vector.broadcast %cst_123 : f32 to vector<16x64xf32>
    %160 = arith.addf %158, %159 : vector<16x64xf32>
    %cst_124 = arith.constant 5.000000e-01 : f32
    %161 = vector.broadcast %cst_124 : f32 to vector<16x64xf32>
    %162 = arith.mulf %161, %160 : vector<16x64xf32>
    %163 = arith.mulf %30, %162 : vector<16x64xf32>
    %164 = arith.mulf %155, %163 : vector<16x64xf32>
    %165 = arith.truncf %164 : vector<16x64xf32> to vector<16x64xbf16>
    %c0_125 = arith.constant 0 : index
    %c0_126 = arith.constant 0 : index
    %166 = vector.load %arg11[%c0_125, %c0_126] : memref<64x128xf32, #tpu.memory_space<vmem>>, vector<64x128xf32>
    %167 = arith.truncf %166 : vector<64x128xf32> to vector<64x128xbf16>
    %cst_127 = arith.constant dense<0.000000e+00> : vector<16x128xf32>
    %168 = tpu.matmul %165, %167, %cst_127 {dimension_numbers = #tpu.dot_dimension_numbers<[1], [0], [0], [1], [0, 0, 1, 1], [], []>} : vector<16x64xbf16>, vector<64x128xbf16>, vector<16x128xf32> -> vector<16x128xf32>
    %169 = arith.addf %24, %168 : vector<16x128xf32>
    %c0_128 = arith.constant 0 : index
    %c0_129 = arith.constant 0 : index
    %170 = vector.load %arg12[%c0_128, %c0_129] : memref<16x128xf32, #tpu.memory_space<vmem>>, vector<16x128xf32>
    tpu.vector_store %arg12[%c0_128, %c0_129], %169 {strides = array<i32>} : memref<16x128xf32, #tpu.memory_space<vmem>>, vector<16x128xf32>,
    return
  }
}

</mosaic_0001>

<bundles_post_ra>
// kernel: tpu_custom_call.1
= control target key start
LH: loop header
LB: loop body
LE: loop exit
PB: predicated region body
PF: predicated region fallthrough
CT: control target
= control target key end

     0   :  { %17 = vsyncpa [#allocation7], 0  ;;  %s3309_s0 = inlined_call_operand.hbm [shape: f32[16,128], index: 0, kind: input, shape index: {}]   ;;  %s3310_s1 = inlined_call_operand.hbm [shape: f32[1,128], index: 1, kind: input, shape index: {}]   ;;  %s3311_s2 = inlined_call_operand.hbm [shape: f32[1,128], index: 2, kind: input, shape index: {}]   ;;  %s3312_s3 = inlined_call_operand.hbm [shape: f32[128,128], index: 3, kind: input, shape index: {}]   ;;  %s3313_s4 = inlined_call_operand.hbm [shape: f32[4,64], index: 4, kind: input, shape index: {}]   ;;  %s3314_s5 = inlined_call_operand.hbm [shape: f32[1,64], index: 5, kind: input, shape index: {}]   ;;  %s3315_s6 = inlined_call_operand.hbm [shape: f32[64,128], index: 6, kind: input, shape index: {}]   ;;  %s3316_s7 = inlined_call_operand.hbm [shape: f32[8,64], index: 7, kind: input, shape index: {}]   ;;  %s3317_s8 = inlined_call_operand.hbm [shape: f32[1,64], index: 8, kind: input, shape index: {}]   ;;  %s3318_s9 = inlined_call_operand.vmem [shape: f32[16,64], index: 9, kind: input, shape index: {}]   ;;  %s3319_s10 = inlined_call_operand.vmem [shape: f32[1,64], index: 10, kind: input, shape index: {}]   ;;  %s3320_s11 = inlined_call_operand.hbm [shape: f32[64,128], index: 11, kind: input, shape index: {}]   ;;  %s3321_s12 = inlined_call_operand.hbm [shape: f32[16,128], index: 12, kind: output, shape index: {}]  }
   0x1   :  { %18 = vsyncpa [#allocation10], 0 }
   0x2   :  { %19 = vsyncpa [#allocation13], 0 }
   0x3   :  { %20 = vsyncpa [#allocation16], 0 }
   0x4   :  { %21 = vsyncpa [#allocation19], 0 }
   0x5   :  { %22 = vsyncpa [#allocation22], 0 }
   0x6   :  { %23 = vsyncpa [#allocation8], 0  ;;  %s2475_s21 = smov [#allocation9]  }
   0x7   :  { %s42_s22 = sshll.u32 %s2475_s21, 4  ;;  %s43_s22 = int_to_ptr.vmem [resolvable:$true] %s42_s22 }
   0x8   :  { %s2249_s23 = scalar_lea.vmem %s43_s22, 16  ;;  %s2253_s24 = scalar_lea.vmem %s43_s22, 32 }
   0x9   :  { %p2250_p0 = scmp.ne.s32.totalorder %s43_s22, %s2249_s23  ;;  %p2254_p1 = scmp.lt.s32.totalorder %s43_s22, %s43_s22 }
   0xa   :  { %p2255_p2 = scmp.lt.s32.totalorder %s2253_s24, %s2249_s23 }
   0xc   :  { %p2256_p3 = por %p2255_p2, %p2254_p1 }
   0xe   :  { %p2257_p4 = pnand %p2256_p3, %p2250_p0 }
  0x10   :  { %2260 = shalt.err (!%p2257_p4)
}
  0x11   :  { %45 = dma.hbm_to_vmem [thread:$0]  %s3310_s1, 16, %s43_s22, [#allocation10]  }
  0x12   :  { %s2476_s27 = smov [#allocation12]   ;;  %s2477_s29 = smov [#allocation15]  }
  0x13   :  { %s61_s28 = sshll.u32 %s2476_s27, 4  ;;  %s84_s30 = sshll.u32 %s2477_s29, 4  ;;  %s62_s28 = int_to_ptr.vmem [resolvable:$true] %s61_s28  ;;  %s85_s30 = int_to_ptr.vmem [resolvable:$true] %s84_s30 }
  0x14   :  { %s2269_s13 = scalar_lea.vmem %s62_s28, 2048  ;;  %p2274_p6 = scmp.lt.s32.totalorder %s62_s28, %s62_s28 }
  0x15   :  { %p2270_p5 = scmp.ne.s32.totalorder %s62_s28, %s2269_s13  ;;  %p2275_p7 = scmp.lt.s32.totalorder %s2269_s13, %s2269_s13 }
  0x17   :  { %p2276_p8 = por %p2275_p7, %p2274_p6 }
  0x19   :  { %p2277_p9 = pnand %p2276_p8, %p2270_p5 }
  0x1b   :  { %2280 = shalt.err (!%p2277_p9)
}
  0x1c   :  { %s2478_s14 = smov 128   ;;  %s2479_s15 = smov 8  }
  0x1d   :  { %67 = dma.hbm_to_vmem [thread:$0]  %s3312_s3, 2048, %s62_s28, [#allocation13], %s2478_s14, %s2478_s14, %s2479_s15  }
  0x1e   :  { %s2289_s1 = scalar_lea.vmem %s85_s30, 16  ;;  %s2293_s18 = scalar_lea.vmem %s85_s30, 32 }
  0x1f   :  { %p2290_p10 = scmp.ne.s32.totalorder %s85_s30, %s2289_s1  ;;  %p2294_p11 = scmp.lt.s32.totalorder %s85_s30, %s85_s30 }
  0x20   :  { %p2295_p12 = scmp.lt.s32.totalorder %s2293_s18, %s2289_s1 }
  0x22   :  { %p2296_p13 = por %p2295_p12, %p2294_p11 }
  0x24   :  { %p2297_p0 = pnand %p2296_p13, %p2290_p10 }
  0x26   :  { %2300 = shalt.err (!%p2297_p0)
}
  0x27   :  { %87 = dma.hbm_to_vmem [thread:$0]  %s3314_s5, 16, %s85_s30, [#allocation16]  }
  0x28   :  { %s2480_s21 = smov [#allocation18]   ;;  %s2481_s23 = smov [#allocation6]  }
  0x29   :  { %s106_s22 = sshll.u32 %s2480_s21, 4  ;;  %s29_s24 = sshll.u32 %s2481_s23, 4  ;;  %s107_s22 = int_to_ptr.vmem [resolvable:$true] %s106_s22  ;;  %s30_s24 = int_to_ptr.vmem [resolvable:$true] %s29_s24 }
  0x2a   :  { %s2309_s25 = scalar_lea.vmem %s107_s22, 128  ;;  %p2314_p2 = scmp.lt.s32.totalorder %s107_s22, %s107_s22 }
  0x2b   :  { %p2310_p1 = scmp.ne.s32.totalorder %s107_s22, %s2309_s25  ;;  %p2315_p3 = scmp.lt.s32.totalorder %s2309_s25, %s2309_s25 }
  0x2d   :  { %p2316_p4 = por %p2315_p3, %p2314_p2 }
  0x2f   :  { %p2317_p5 = pnand %p2316_p4, %p2310_p1 }
  0x31   :  { %2320 = shalt.err (!%p2317_p5)
}
  0x32   :  { %109 = dma.hbm_to_vmem [thread:$0]  %s3316_s7, 128, %s107_s22, [#allocation19]  }
  0x33   :  { %s2329_s27 = scalar_lea.vmem %s30_s24, 256  ;;  %p2334_p7 = scmp.lt.s32.totalorder %s30_s24, %s30_s24 }
  0x34   :  { %p2330_p6 = scmp.ne.s32.totalorder %s30_s24, %s2329_s27  ;;  %p2335_p8 = scmp.lt.s32.totalorder %s2329_s27, %s2329_s27 }
  0x36   :  { %p2336_p9 = por %p2335_p8, %p2334_p7 }
  0x38   :  { %p2337_p10 = pnand %p2336_p9, %p2330_p6 }
  0x3a   :  { %2340 = shalt.err (!%p2337_p10)
}
  0x3b   :  { %35 = dma.hbm_to_vmem [thread:$0]  %s3309_s0, 256, %s30_s24, [#allocation7], %s2478_s14, %s2478_s14, %s2479_s15  }
  0x3c   :  { %s2482_s29 = smov [#allocation11]   ;;  %s2483_s13 = smov [#allocation14]  }
  0x3d   :  { %s52_s30 = sshll.u32 %s2482_s29, 4  ;;  %s74_s7 = sshll.u32 %s2483_s13, 4  ;;  %s53_s30 = int_to_ptr.vmem [resolvable:$true] %s52_s30  ;;  %s75_s7 = int_to_ptr.vmem [resolvable:$true] %s74_s7 }
  0x3e   :  { %s2349_s16 = scalar_lea.vmem %s53_s30, 16  ;;  %s2353_s17 = scalar_lea.vmem %s53_s30, 32 }
  0x3f   :  { %p2350_p11 = scmp.ne.s32.totalorder %s53_s30, %s2349_s16  ;;  %p2354_p12 = scmp.lt.s32.totalorder %s53_s30, %s53_s30 }
  0x40   :  { %p2355_p13 = scmp.lt.s32.totalorder %s2353_s17, %s2349_s16 }
  0x42   :  { %p2356_p0 = por %p2355_p13, %p2354_p12 }
  0x44   :  { %p2357_p1 = pnand %p2356_p0, %p2350_p11 }
  0x46   :  { %2360 = shalt.err (!%p2357_p1)
}
  0x47   :  { %55 = dma.hbm_to_vmem [thread:$0]  %s3311_s2, 16, %s53_s30, [#allocation10]  }
  0x48   :  { %s2369_s19 = scalar_lea.vmem %s75_s7, 64  ;;  %p2374_p3 = scmp.lt.s32.totalorder %s75_s7, %s75_s7 }
  0x49   :  { %p2370_p2 = scmp.ne.s32.totalorder %s75_s7, %s2369_s19  ;;  %p2375_p4 = scmp.lt.s32.totalorder %s2369_s19, %s2369_s19 }
  0x4b   :  { %p2376_p5 = por %p2375_p4, %p2374_p3 }
  0x4d   :  { %p2377_p6 = pnand %p2376_p5, %p2370_p2 }
  0x4f   :  { %2380 = shalt.err (!%p2377_p6)
}
  0x50   :  { %77 = dma.hbm_to_vmem [thread:$0]  %s3313_s4, 64, %s75_s7, [#allocation13]  }
  0x51   :  { %s2484_s21 = smov [#allocation17]   ;;  %s2485_s23 = smov [#allocation20]  }
  0x52   :  { %s93_s22 = sshll.u32 %s2484_s21, 4  ;;  %s116_s24 = sshll.u32 %s2485_s23, 4  ;;  %s94_s22 = int_to_ptr.vmem [resolvable:$true] %s93_s22  ;;  %s117_s24 = int_to_ptr.vmem [resolvable:$true] %s116_s24 }
  0x53   :  { %s2389_s25 = scalar_lea.vmem %s94_s22, 1024  ;;  %p2394_p8 = scmp.lt.s32.totalorder %s94_s22, %s94_s22 }
  0x54   :  { %p2390_p7 = scmp.ne.s32.totalorder %s94_s22, %s2389_s25  ;;  %p2395_p9 = scmp.lt.s32.totalorder %s2389_s25, %s2389_s25 }
  0x56   :  { %p2396_p10 = por %p2395_p9, %p2394_p8 }
  0x58   :  { %p2397_p11 = pnand %p2396_p10, %p2390_p7 }
  0x5a   :  { %2400 = shalt.err (!%p2397_p11)
}
  0x5b   :  { %99 = dma.hbm_to_vmem [thread:$0]  %s3315_s6, 1024, %s94_s22, [#allocation16], %s2478_s14, %s2478_s14, %s2479_s15  }
  0x5c   :  { %s2409_s4 = scalar_lea.vmem %s117_s24, 16  ;;  %s2413_s26 = scalar_lea.vmem %s117_s24, 32 }
  0x5d   :  { %p2410_p12 = scmp.ne.s32.totalorder %s117_s24, %s2409_s4  ;;  %p2414_p13 = scmp.lt.s32.totalorder %s117_s24, %s117_s24 }
  0x5e   :  { %p2415_p0 = scmp.lt.s32.totalorder %s2413_s26, %s2409_s4 }
  0x60   :  { %p2416_p1 = por %p2415_p0, %p2414_p13 }
  0x62   :  { %p2417_p2 = pnand %p2416_p1, %p2410_p12 }
  0x64   :  { %2420 = shalt.err (!%p2417_p2)
}
  0x65   :  { %119 = dma.hbm_to_vmem [thread:$0]  %s3317_s8, 16, %s117_s24, [#allocation19]  }
  0x66   :  { %s2486_s28 = smov [#allocation21]  }
  0x67   :  { %s129_s29 = sshll.u32 %s2486_s28, 4  ;;  %s130_s29 = int_to_ptr.vmem [resolvable:$true] %s129_s29 }
  0x68   :  { %s2429_s30 = scalar_lea.vmem %s130_s29, 1024  ;;  %p2434_p4 = scmp.lt.s32.totalorder %s130_s29, %s130_s29 }
  0x69   :  { %p2430_p3 = scmp.ne.s32.totalorder %s130_s29, %s2429_s30  ;;  %p2435_p5 = scmp.lt.s32.totalorder %s2429_s30, %s2429_s30 }
  0x6b   :  { %p2436_p6 = por %p2435_p5, %p2434_p4 }
  0x6d   :  { %p2437_p7 = pnand %p2436_p6, %p2430_p3 }
  0x6f   :  { %2440 = shalt.err (!%p2437_p7)
}
  0x70   :  { %135 = dma.hbm_to_vmem [thread:$0]  %s3320_s11, 1024, %s130_s29, [#allocation22], %s2478_s14, %s2478_s14, %s2479_s15  }
  0x71   :  { %2461 = dma.done.wait [#allocation7], 256  }
  0x72   :  { %2462 = vsyncadd [#allocation7], 4294967040 }
  0x73   :  { %2463 = dma.done.wait [#allocation10], 32  }
  0x74   :  { %2464 = vsyncadd [#allocation10], 4294967264 }
  0x75   :  { %2465 = dma.done.wait [#allocation13], 2112  }
  0x76   :  { %2466 = vsyncadd [#allocation13], 4294965184 }
  0x77   :  { %2467 = dma.done.wait [#allocation16], 1040  }
  0x78   :  { %2468 = vsyncadd [#allocation16], 4294966256 }
  0x79   :  { %2469 = dma.done.wait [#allocation19], 144  }
  0x7a   :  { %2470 = vsyncadd [#allocation19], 4294967152 }
  0x7b   :  { %2471 = dma.done.wait [#allocation22], 1024  }
  0x7c   :  { %2472 = vsyncadd [#allocation22], 4294966272  ;;  %v2599_v0 = vld [vmem:[#allocation6] sm:$0xff]  ;;  %v2601_v1 = vld [vmem:[#allocation6 + $0x8] sm:$0xff]  ;;  %v3322_v7 = vmov 0.0   ;;  %vm2488_vm0 = vmmov 0  }
  0x7d   :  { %169 = vadd.xlane.f32.xlu0 %v2599_v0  ;;  %v175_v2 = vmul.f32 %v2599_v0, %v2599_v0  ;;  %v176_v3 = vmul.f32 %v2601_v1, %v2601_v1  ;;  %v228_v4 = vld [vmem:[#allocation12 + $0x70] sm:$0xff]  ;;  %v229_v5 = vld [vmem:[#allocation12 + $0x78] sm:$0xff]  ;;  %2086 = vmatprep.subr.bf16.mxu0 %v3322_v7  ;;  %v226_v8 = vld [vmem:[#allocation12 + $0x60] sm:$0xff]  ;;  %vm280_vm1 = vcmask 523264   ;;  %s2489_s8 = smov 64   ;;  %vm410_vm2 = vcmask 1043456  }
  0x7e   :  { %v237_v6 = vpack.c.bf16 %v229_v5, %v228_v4  ;;  %2106 = vmatprep.subr.bf16.mxu1 %v3322_v7  ;;  %v227_v9 = vld [vmem:[#allocation12 + $0x68] sm:$0xff]  ;;  %v224_v11 = vld [vmem:[#allocation12 + $0x50] sm:$0xff]  ;;  %v225_v12 = vld [vmem:[#allocation12 + $0x58] sm:$0xff]  ;;  %2102 = vmatprep.mubr.msk.bf16.mxu0 %vm2488_vm0, %v3322_v7  ;;  %281 = vst.msk [vmem:[#allocation2] sm:$0xff] %vm280_vm1, %v3322_v7  ;;  %v285_v4 = vlaneseq  ;;  %vm406_vm3 = vcmask 64512   ;;  %vm1952_vm4 = vcmask 1041409  }
  0x7f   :  { %177 = vadd.xlane.f32.xlu1 %v175_v2  ;;  %v236_v10 = vpack.c.bf16 %v227_v9, %v226_v8  ;;  %v235_v13 = vpack.c.bf16 %v225_v12, %v224_v11  ;;  %v222_v14 = vld [vmem:[#allocation12 + $0x40] sm:$0xff]  ;;  %v223_v15 = vld [vmem:[#allocation12 + $0x48] sm:$0xff]  ;;  %v220_v16 = vld [vmem:[#allocation12 + $0x30] sm:$0xff]  ;;  %2114 = vmatprep.mubr.msk.bf16.mxu1 %vm2488_vm0, %v3322_v7  ;;  %vm1955_vm5 = vcmask 1042434   ;;  %vm1958_vm6 = vcmask 1043459  }
  0x80   :  { %2087 = vmatpush3.bf16.msra.mxu0 %v237_v6  ;;  %v234_v17 = vpack.c.bf16 %v223_v15, %v222_v14  ;;  %v221_v18 = vld [vmem:[#allocation12 + $0x38] sm:$0xff]  ;;  %v218_v20 = vld [vmem:[#allocation12 + $0x20] sm:$0xff]  ;;  %v219_v21 = vld [vmem:[#allocation12 + $0x28] sm:$0xff]  ;;  %v2636_v5 = vshrl.u32 %v285_v4, 7  ;;  %vm1961_vm7 = vcmask 1044484   ;;  %vm1964_vm8 = vcmask 1045509  }
  0x81   :  { %171 = vadd.xlane.f32.xlu0 %v2601_v1  ;;  %2088 = vmatprep.subr.bf16.mxu0 %v3322_v7  ;;  %v233_v19 = vpack.c.bf16 %v221_v18, %v220_v16  ;;  %v232_v22 = vpack.c.bf16 %v219_v21, %v218_v20  ;;  %v216_v23 = vld [vmem:[#allocation12 + $0x10] sm:$0xff]  ;;  %v217_v24 = vld [vmem:[#allocation12 + $0x18] sm:$0xff]  ;;  %v214_v26 = vld [vmem:[#allocation12] sm:$0xff]  ;;  %vm1967_vm9 = vcmask 1046534   ;;  %vm1970_vm10 = vcmask 1047559  }
  0x82   :  { %v231_v25 = vpack.c.bf16 %v217_v24, %v216_v23  ;;  %v215_v27 = vld [vmem:[#allocation12 + $0x8] sm:$0xff]  ;;  %v2057_v46 = vld [vmem:[#allocation9] ss:$0 sm:$0xff]  ;;  %v2058_v51 = vld [vmem:[#allocation11] ss:$0 sm:$0xff]  ;;  %v2639_v6 = vsub.s32 3, %v2636_v5 }
  0x83   :  { %179 = vadd.xlane.f32.xlu1 %v176_v3  ;;  %v230_v28 = vpack.c.bf16 %v215_v27, %v214_v26  ;;  %v346_v56 = vld [vmem:[#allocation17 + $0x30] sm:$0xff]  ;;  %v347_v57 = vld [vmem:[#allocation17 + $0x38] sm:$0xff]  ;;  %v344_v59 = vld [vmem:[#allocation17 + $0x20] sm:$0xff]  ;;  %v2644_v11 = vsub.s32 2, %v2636_v5  ;;  %v2647_v14 = vsub.s32 1, %v2636_v5  ;;  %v2651_v18 = vsub.s32 0, %v2636_v5 }
  0x84   :  { %2089 = vmatpush3.bf16.msra.mxu0 %v236_v10  ;;  %v351_v58 = vpack.c.bf16 %v347_v57, %v346_v56  ;;  %v345_v60 = vld [vmem:[#allocation17 + $0x28] sm:$0xff]  ;;  %v342_v62 = vld [vmem:[#allocation17 + $0x10] sm:$0xff]  ;;  %v343_v63 = vld [vmem:[#allocation17 + $0x18] sm:$0xff] }
  0x85   :  { %2090 = vmatprep.subr.bf16.mxu0 %v3322_v7  ;;  %v350_v61 = vpack.c.bf16 %v345_v60, %v344_v59  ;;  %v341_v2 = vld [vmem:[#allocation17 + $0x8] sm:$0xff]  ;;  %v279_v8 = vld [vmem:[#allocation14] sm:$0xf]  ;;  %v2059_v20 = vld [vmem:[#allocation15] ss:$0 sm:$0xff] }
  0x86   :  { %2107 = vmatpush3.bf16.msra.mxu1 %v351_v58  ;;  %v288_v10 = vrot.slane %v279_v8, %v2639_v6  ;;  %v324_v27 = vrot.slane %v279_v8, %v2651_v18 }
  0x87   :  { %2108 = vmatprep.subr.bf16.mxu1 %v3322_v7 }
  0x88   :  { %2091 = vmatpush3.bf16.msra.mxu0 %v235_v13 }
  0x89   :  { %2092 = vmatprep.subr.bf16.mxu0 %v3322_v7 }
  0x8a   :  { %2109 = vmatpush3.bf16.msra.mxu1 %v350_v61 }
  0x8b   :  { %2110 = vmatprep.subr.bf16.mxu1 %v3322_v7 }
  0x8c   :  { %2093 = vmatpush3.bf16.msra.mxu0 %v234_v17  ;;  %v304_v17 = vrot.slane %v279_v8, %v2644_v11 }
  0x8d   :  { %2094 = vmatprep.subr.bf16.mxu0 %v3322_v7 }
  0x90   :  { %2095 = vmatpush3.bf16.msra.mxu0 %v233_v19 }
  0x91   :  { %2096 = vmatprep.subr.bf16.mxu0 %v3322_v7 }
  0x94   :  { %2097 = vmatpush3.bf16.msra.mxu0 %v232_v22  ;;  %v314_v22 = vrot.slane %v279_v8, %v2647_v14 }
  0x95   :  { %2098 = vmatprep.subr.bf16.mxu0 %v3322_v7 }
  0x98   :  { %2099 = vmatpush3.bf16.msra.mxu0 %v231_v25 }
  0x99   :  { %2100 = vmatprep.subr.bf16.mxu0 %v3322_v7 }
  0x9c   :  { %2101 = vmatpush3.bf16.msra.mxu0 %v230_v28 }
 0x106   :  { %v170_v29 = vpop.xlane.xlu0 %169 }
 0x107   :  { %v173_v30 = vmul.f32 0.03125, %v170_v29 }
 0x108   :  { %v178_v31 = vpop.xlane.xlu1 %177 }
 0x109   :  { %v183_v32 = vmul.f32 %v173_v30, %v173_v30  ;;  %v181_v33 = vmul.f32 0.03125, %v178_v31  ;;  %v191_v43 = vsub.f32 %v2599_v0, %v173_v30  ;;  %v349_v0 = vpack.c.bf16 %v343_v63, %v342_v62 }
 0x10a   :  { %v172_v34 = vpop.xlane.xlu0 %171 }
 0x10b   :  { %v185_v35 = vsub.f32 %v181_v33, %v183_v32  ;;  %v174_v36 = vmul.f32 0.03125, %v172_v34  ;;  %2111 = vmatpush3.bf16.msra.mxu1 %v349_v0 }
 0x10c   :  { %v180_v37 = vpop.xlane.xlu1 %179  ;;  %2112 = vmatprep.subr.bf16.mxu1 %v3322_v7 }
 0x10d   :  { %v187_v38 = vadd.f32 1e-05, %v185_v35  ;;  %v184_v39 = vmul.f32 %v174_v36, %v174_v36  ;;  %v182_v40 = vmul.f32 0.03125, %v180_v37  ;;  %v192_v47 = vsub.f32 %v2601_v1, %v174_v36  ;;  %v340_v1 = vld [vmem:[#allocation17] sm:$0xff] }
 0x10e   :  { %v348_v3 = vpack.c.bf16 %v341_v2, %v340_v1  ;;  %v397_v1 = vld [vmem:[#allocation18] sm:$0xff] }
 0x10f   :  { %2153 = vrsqrt.f32 %v187_v38  ;;  %v186_v41 = vsub.f32 %v182_v40, %v184_v39  ;;  %v398_v8 = vpack.c.bf16 %v397_v1, %v397_v1 }
 0x110   :  { %2113 = vmatpush3.bf16.msra.mxu1 %v348_v3 }
 0x111   :  { %v188_v42 = vadd.f32 1e-05, %v186_v41  ;;  %2118 = vmatprep.subr.bf16.mxu1 %v3322_v7 }
 0x113   :  { %2155 = vrsqrt.f32 %v188_v42 }
 0x11c   :  { %v2154_v44 = vpop.eup %2153 }
 0x11d   :  { %v193_v45 = vmul.f32 %v2154_v44, %v191_v43 }
 0x11f   :  { %v202_v50 = vmul.f32 %v2057_v46, %v193_v45 }
 0x120   :  { %v2156_v48 = vpop.eup %2155 }
 0x121   :  { %v194_v49 = vmul.f32 %v2156_v48, %v192_v47  ;;  %v2624_v53 = vadd.f32 %v2058_v51, %v202_v50 }
 0x123   :  { %v203_v52 = vmul.f32 %v2057_v46, %v194_v49  ;;  %3326 = vst [vmem:[#allocation31_spill] sm:$0xff] %v2624_v53 }
 0x125   :  { %v2626_v54 = vadd.f32 %v2058_v51, %v203_v52 }
 0x127   :  { %3327 = vst [vmem:[#allocation32_spill] sm:$0xff] %v2626_v54  ;;  %v213_v55 = vpack.c.bf16 %v2626_v54, %v2624_v53 }
 0x129   :  { %2103 = vmatmul.mubr.bf16.vlgmr.msra.gmra.mxu0 %v213_v55 }
 0x1e9   :  { %v272_v9 = vpop.f32.mrf.mxu0 }
 0x1ea   :  { %282 = vst.msk [vmem:[#allocation2 + $0x8] sm:$0xff] %vm280_vm1, %v272_v9  ;;  %v1801_v12 = vmul.f32 0.5, %v272_v9  ;;  %v289_v16 = vmul.f32 %v288_v10, %v272_v9 }
 0x1eb   :  { %v2104_v13 = vpop.f32.mrf.mxu0 }
 0x1ec   :  { %2157 = vtanh.f32 %v1801_v12  ;;  %v297_v25 = vadd.f32 %v2059_v20, %v289_v16  ;;  %v412_v13 = vsel %vm410_vm2, %v398_v8, 0 }
 0x1ed   :  { %v275_v15 = vpop.f32.mrf.mxu0 }
 0x1ee   :  { %283 = vst.msk [vmem:[#allocation2 + $0x10] sm:$0xff] %vm280_vm1, %v275_v15  ;;  %v1802_v19 = vmul.f32 0.5, %v275_v15  ;;  %v290_v28 = vmul.f32 %v288_v10, %v275_v15 }
 0x1ef   :  { %v2105_v21 = vpop.f32.mrf.mxu0 }
 0x1f0   :  { %2159 = vtanh.f32 %v1802_v19  ;;  %v298_v36 = vadd.f32 %v2059_v20, %v290_v28  ;;  %v941_v20 = vsub.s32 4, %v2636_v5  ;;  %v953_v21 = vsub.s32 5, %v2636_v5 }
 0x1f1   :  { %v299_v23 = vld [vmem:[#allocation2 + $0x6] sm:$0xff] }
 0x1f2   :  { %v309_v24 = vld [vmem:[#allocation2 + $0x4] sm:$0xff]  ;;  %v305_v26 = vmul.f32 %v304_v17, %v299_v23  ;;  %v977_v23 = vsub.s32 7, %v2636_v5 }
 0x1f3   :  { %v319_v29 = vld [vmem:[#allocation2 + $0x2] sm:$0xff]  ;;  %v315_v31 = vmul.f32 %v314_v22, %v309_v24 }
 0x1f4   :  { %v307_v30 = vadd.f32 %v305_v26, %v297_v25  ;;  %v325_v35 = vmul.f32 %v324_v27, %v319_v29 }
 0x1f5   :  { %v300_v32 = vld [vmem:[#allocation2 + $0xe] sm:$0xff] }
 0x1f6   :  { %v310_v33 = vld [vmem:[#allocation2 + $0xc] sm:$0xff]  ;;  %v317_v34 = vadd.f32 %v315_v31, %v307_v30  ;;  %v306_v37 = vmul.f32 %v304_v17, %v300_v32 }
 0x1f7   :  { %v320_v38 = vld [vmem:[#allocation2 + $0xa] sm:$0xff]  ;;  %v316_v41 = vmul.f32 %v314_v22, %v310_v33  ;;  %v965_v22 = vsub.s32 6, %v2636_v5 }
 0x1f8   :  { %v327_v39 = vadd.f32 %v325_v35, %v317_v34  ;;  %v308_v40 = vadd.f32 %v306_v37, %v298_v36  ;;  %v326_v46 = vmul.f32 %v324_v27, %v320_v38 }
 0x1f9   :  { %v2158_v42 = vpop.eup %2157 }
 0x1fa   :  { %v329_v43 = vmul.f32 0.5, %v327_v39  ;;  %v1805_v44 = vadd.f32 1.0, %v2158_v42  ;;  %v318_v45 = vadd.f32 %v316_v41, %v308_v40 }
 0x1fc   :  { %2161 = vtanh.f32 %v329_v43  ;;  %v1807_v47 = vmul.f32 0.5, %v1805_v44  ;;  %v328_v48 = vadd.f32 %v326_v46, %v318_v45 }
 0x1fd   :  { %v2160_v49 = vpop.eup %2159 }
 0x1fe   :  { %v2656_v50 = vmul.f32 %v1807_v47, %v272_v9  ;;  %v330_v51 = vmul.f32 0.5, %v328_v48  ;;  %v1806_v52 = vadd.f32 1.0, %v2160_v49 }
 0x200   :  { %2163 = vtanh.f32 %v330_v51  ;;  %v1808_v55 = vmul.f32 0.5, %v1806_v52  ;;  %1827 = vrot.lane.b32.xlu0 %v2656_v50, %s2489_s8  ;;  %v1815_v56 = vrot.slane %v2656_v50, 3  ;;  %v1813_v58 = vrot.slane %v2656_v50, 1 }
 0x201   :  { %v1814_v60 = vrot.slane %v2656_v50, 2  ;;  %v1818_v43 = vrot.slane %v2656_v50, 6  ;;  %v1819_v46 = vrot.slane %v2656_v50, 7 }
 0x202   :  { %v2661_v57 = vmul.f32 %v1808_v55, %v275_v15  ;;  %1833 = vrot.lane.b32.xlu1 %v1815_v56, %s2489_s8 }
 0x204   :  { %1829 = vrot.lane.b32.xlu0 %v1813_v58, %s2489_s8  ;;  %v1820_v59 = vrot.slane %v2661_v57, 1  ;;  %v1821_v61 = vrot.slane %v2661_v57, 2  ;;  %v1823_v42 = vrot.slane %v2661_v57, 4  ;;  %v1824_v45 = vrot.slane %v2661_v57, 5 }
 0x205   :  { %v1826_v51 = vrot.slane %v2661_v57, 7 }
 0x206   :  { %1845 = vrot.lane.b32.xlu1 %v1820_v59, %s2489_s8 }
 0x208   :  { %1831 = vrot.lane.b32.xlu0 %v1814_v60, %s2489_s8 }
 0x209   :  { %v2162_v62 = vpop.eup %2161 }
 0x20a   :  { %1847 = vrot.lane.b32.xlu1 %v1821_v61, %s2489_s8  ;;  %v333_v63 = vadd.f32 1.0, %v2162_v62 }
 0x20c   :  { %v335_v3 = vmul.f32 0.5, %v333_v63 }
 0x20d   :  { %v2164_v0 = vpop.eup %2163 }
 0x20e   :  { %v334_v2 = vadd.f32 1.0, %v2164_v0  ;;  %v2672_v9 = vmul.f32 %v335_v3, %v327_v39 }
 0x210   :  { %v336_v4 = vmul.f32 0.5, %v334_v2 }
 0x212   :  { %v2674_v10 = vmul.f32 %v336_v4, %v328_v48  ;;  %v1825_v48 = vrot.slane %v2661_v57, 6 }
 0x214   :  { %v339_v12 = vpack.c.bf16 %v2674_v10, %v2672_v9 }
 0x216   :  { %2115 = vmatmul.mubr.msk.bf16.vlgmr.msra.gmra.mxu1 %vm280_vm1, %v339_v12 }
 0x217   :  { %2119 = vmatpush3.bf16.msra.mxu1 %v412_v13  ;;  %2120 = vmatprep.mubr.msk.bf16.mxu1 %vm2488_vm0, %v3322_v7  ;;  %v2061_v13 = vld [vmem:[#allocation20] ss:$0 sm:$0xff] }
 0x218   :  { %2124 = vmatprep.subr.bf16.mxu1 %v3322_v7 }
 0x272   :  { %v2740_v47 = vpop.permute.xlu0 %1827 }
 0x273   :  { %3330 = vst [vmem:[#allocation35_spill] sm:$0xff] %v2740_v47 }
 0x274   :  { %v2726_v41 = vpop.permute.xlu1 %1833 }
 0x275   :  { %3328 = vst [vmem:[#allocation33_spill] sm:$0xff] %v2726_v41 }
 0x276   :  { %v2749_v55 = vpop.permute.xlu0 %1829 }
 0x277   :  { %3332 = vst [vmem:[#allocation37_spill] sm:$0xff] %v2749_v55 }
 0x278   :  { %v2734_v44 = vpop.permute.xlu1 %1845 }
 0x279   :  { %3329 = vst [vmem:[#allocation34_spill] sm:$0xff] %v2734_v44 }
 0x27a   :  { %v2754_v56 = vpop.permute.xlu0 %1831 }
 0x27b   :  { %3333 = vst [vmem:[#allocation38_spill] sm:$0xff] %v2754_v56 }
 0x27c   :  { %v2743_v49 = vpop.permute.xlu1 %1847 }
 0x27d   :  { %3331 = vst [vmem:[#allocation36_spill] sm:$0xff] %v2743_v49 }
 0x2d6   :  { %v389_v15 = vpop.f32.mrf.mxu1 }
 0x2d7   :  { %v894_v16 = vrot.slane %v389_v15, %v2651_v18  ;;  %v906_v24 = vrot.slane %v389_v15, %v2647_v14  ;;  %v918_v25 = vrot.slane %v389_v15, %v2644_v11  ;;  %v930_v32 = vrot.slane %v389_v15, %v2639_v6 }
 0x2d8   :  { %v2116_v17 = vpop.f32.mrf.mxu1  ;;  %v942_v33 = vrot.slane %v389_v15, %v941_v20  ;;  %v954_v34 = vrot.slane %v389_v15, %v953_v21  ;;  %v966_v35 = vrot.slane %v389_v15, %v965_v22  ;;  %v978_v36 = vrot.slane %v389_v15, %v977_v23 }
 0x2d9   :  { %901 = vbcast.lane.b32.xlu1 %v894_v16, 272  ;;  %897 = vbcast.lane.b32.xlu0 %v894_v16, 264 }
 0x2da   :  { %v392_v19 = vpop.f32.mrf.mxu1 }
 0x2db   :  { %v396_v26 = vpack.c.bf16 %v392_v19, %v389_v15  ;;  %v2689_v28 = vrot.slane %v392_v19, %v941_v20  ;;  %v2691_v29 = vrot.slane %v392_v19, %v953_v21  ;;  %v2693_v30 = vrot.slane %v392_v19, %v965_v22 }
 0x2dc   :  { %v2117_v27 = vpop.f32.mrf.mxu1  ;;  %v2695_v31 = vrot.slane %v392_v19, %v977_v23  ;;  %v990_v37 = vrot.slane %v392_v19, %v2651_v18  ;;  %v1002_v38 = vrot.slane %v392_v19, %v2647_v14  ;;  %v1014_v39 = vrot.slane %v392_v19, %v2644_v11 }
 0x2dd   :  { %909 = vbcast.lane.b32.xlu1 %v906_v24, 264  ;;  %921 = vbcast.lane.b32.xlu0 %v918_v25, 264  ;;  %v1026_v40 = vrot.slane %v392_v19, %v2639_v6  ;;  %v1816_v6 = vrot.slane %v2656_v50, 4  ;;  %v1822_v11 = vrot.slane %v2661_v57, 3  ;;  %v1817_v14 = vrot.slane %v2656_v50, 5 }
 0x2de   :  { %2121 = vmatmul.mubr.msk.bf16.vlgmr.msra.gmra.mxu1 %vm406_vm3, %v396_v26 }
 0x2df   :  { %2132 = vmatprep.mubr.msk.bf16.mxu1 %vm2488_vm0, %v3322_v7 }
 0x2e1   :  { %913 = vbcast.lane.b32.xlu1 %v906_v24, 272  ;;  %933 = vbcast.lane.b32.xlu0 %v930_v32, 264 }
 0x2e5   :  { %925 = vbcast.lane.b32.xlu1 %v918_v25, 272  ;;  %945 = vbcast.lane.b32.xlu0 %v942_v33, 264 }
 0x2e9   :  { %937 = vbcast.lane.b32.xlu1 %v930_v32, 272  ;;  %957 = vbcast.lane.b32.xlu0 %v954_v34, 264 }
 0x2ed   :  { %949 = vbcast.lane.b32.xlu1 %v942_v33, 272  ;;  %969 = vbcast.lane.b32.xlu0 %v966_v35, 264 }
 0x2f1   :  { %961 = vbcast.lane.b32.xlu1 %v954_v34, 272  ;;  %981 = vbcast.lane.b32.xlu0 %v978_v36, 264 }
 0x2f5   :  { %973 = vbcast.lane.b32.xlu1 %v966_v35, 272  ;;  %1418 = vbcast.lane.b32.xlu0 %v906_v24, 280 }
 0x2f9   :  { %985 = vbcast.lane.b32.xlu1 %v978_v36, 272  ;;  %1426 = vbcast.lane.b32.xlu0 %v918_v25, 280 }
 0x2fd   :  { %1422 = vbcast.lane.b32.xlu1 %v906_v24, 288  ;;  %1410 = vbcast.lane.b32.xlu0 %v894_v16, 280 }
 0x301   :  { %1430 = vbcast.lane.b32.xlu1 %v918_v25, 288  ;;  %1434 = vbcast.lane.b32.xlu0 %v930_v32, 280 }
 0x305   :  { %1414 = vbcast.lane.b32.xlu1 %v894_v16, 288  ;;  %1442 = vbcast.lane.b32.xlu0 %v942_v33, 280 }
 0x309   :  { %1438 = vbcast.lane.b32.xlu1 %v930_v32, 288  ;;  %1450 = vbcast.lane.b32.xlu0 %v954_v34, 280 }
 0x30d   :  { %1446 = vbcast.lane.b32.xlu1 %v942_v33, 288  ;;  %1458 = vbcast.lane.b32.xlu0 %v966_v35, 280 }
 0x311   :  { %1454 = vbcast.lane.b32.xlu1 %v954_v34, 288  ;;  %1466 = vbcast.lane.b32.xlu0 %v978_v36, 280  ;;  %v473_v34 = vld [vmem:[%s3318_s9] sm:$0xff] }
 0x315   :  { %1462 = vbcast.lane.b32.xlu1 %v966_v35, 288  ;;  %993 = vbcast.lane.b32.xlu0 %v990_v37, 264 }
 0x319   :  { %1470 = vbcast.lane.b32.xlu1 %v978_v36, 288  ;;  %1005 = vbcast.lane.b32.xlu0 %v1002_v38, 264 }
 0x31d   :  { %997 = vbcast.lane.b32.xlu1 %v990_v37, 272  ;;  %1017 = vbcast.lane.b32.xlu0 %v1014_v39, 264 }
 0x321   :  { %1009 = vbcast.lane.b32.xlu1 %v1002_v38, 272  ;;  %1029 = vbcast.lane.b32.xlu0 %v1026_v40, 264 }
 0x325   :  { %1021 = vbcast.lane.b32.xlu1 %v1014_v39, 272  ;;  %1041 = vbcast.lane.b32.xlu0 %v2689_v28, 264 }
 0x329   :  { %1033 = vbcast.lane.b32.xlu1 %v1026_v40, 272  ;;  %1053 = vbcast.lane.b32.xlu0 %v2691_v29, 264 }
 0x32d   :  { %1045 = vbcast.lane.b32.xlu1 %v2689_v28, 272  ;;  %1065 = vbcast.lane.b32.xlu0 %v2693_v30, 264 }
 0x331   :  { %1057 = vbcast.lane.b32.xlu1 %v2691_v29, 272  ;;  %1077 = vbcast.lane.b32.xlu0 %v2695_v31, 264 }
 0x335   :  { %1069 = vbcast.lane.b32.xlu1 %v2693_v30, 272  ;;  %1482 = vbcast.lane.b32.xlu0 %v1002_v38, 280 }
 0x339   :  { %1081 = vbcast.lane.b32.xlu1 %v2695_v31, 272  ;;  %1490 = vbcast.lane.b32.xlu0 %v1014_v39, 280 }
 0x33d   :  { %1486 = vbcast.lane.b32.xlu1 %v1002_v38, 288  ;;  %1474 = vbcast.lane.b32.xlu0 %v990_v37, 280 }
 0x341   :  { %1494 = vbcast.lane.b32.xlu1 %v1014_v39, 288  ;;  %1498 = vbcast.lane.b32.xlu0 %v1026_v40, 280  ;;  %v474_v39 = vld [vmem:[%s3318_s9 + $0x8] sm:$0xff] }
 0x345   :  { %1478 = vbcast.lane.b32.xlu1 %v990_v37, 288  ;;  %1506 = vbcast.lane.b32.xlu0 %v2689_v28, 280 }
 0x349   :  { %1502 = vbcast.lane.b32.xlu1 %v1026_v40, 288  ;;  %1514 = vbcast.lane.b32.xlu0 %v2691_v29, 280  ;;  %v475_v40 = vmul.f32 1.442695, %v473_v34 }
 0x34b   :  { %v2747_v52 = vpop.permute.xlu1 %901  ;;  %v2756_v58 = vpop.permute.xlu0 %897 }
 0x34d   :  { %1510 = vbcast.lane.b32.xlu1 %v2689_v28, 288  ;;  %1522 = vbcast.lane.b32.xlu0 %v2693_v30, 280 }
 0x34f   :  { %v2752_v50 = vpop.permute.xlu1 %909  ;;  %v2760_v60 = vpop.permute.xlu0 %921 }
 0x351   :  { %1518 = vbcast.lane.b32.xlu1 %v2691_v29, 288  ;;  %1530 = vbcast.lane.b32.xlu0 %v2695_v31, 280 }
 0x353   :  { %v2758_v59 = vpop.permute.xlu1 %913  ;;  %v2764_v62 = vpop.permute.xlu0 %933 }
 0x355   :  { %1526 = vbcast.lane.b32.xlu1 %v2693_v30, 288  ;;  %1843 = vrot.lane.b32.xlu0 %v2661_v57, %s2489_s8 }
 0x357   :  { %v2762_v61 = vpop.permute.xlu1 %925  ;;  %v2768_v63 = vpop.permute.xlu0 %945 }
 0x359   :  { %1534 = vbcast.lane.b32.xlu1 %v2695_v31, 288  ;;  %1835 = vrot.lane.b32.xlu0 %v1816_v6, %s2489_s8 }
 0x35b   :  { %v2766_v57 = vpop.permute.xlu1 %937  ;;  %v2772_v1 = vpop.permute.xlu0 %957 }
 0x35d   :  { %1849 = vrot.lane.b32.xlu1 %v1822_v11, %s2489_s8  ;;  %1837 = vrot.lane.b32.xlu0 %v1817_v14, %s2489_s8  ;;  %v477_v11 = vmul.f32 1.442695, %v474_v39 }
 0x35f   :  { %v2770_v0 = vpop.permute.xlu1 %949  ;;  %v2776_v3 = vpop.permute.xlu0 %969 }
 0x361   :  { %1851 = vrot.lane.b32.xlu1 %v1823_v42, %s2489_s8  ;;  %1839 = vrot.lane.b32.xlu0 %v1818_v43, %s2489_s8 }
 0x363   :  { %v2774_v2 = vpop.permute.xlu1 %961  ;;  %v2780_v8 = vpop.permute.xlu0 %981 }
 0x365   :  { %1853 = vrot.lane.b32.xlu1 %v1824_v45, %s2489_s8  ;;  %1841 = vrot.lane.b32.xlu0 %v1819_v46, %s2489_s8  ;;  %v2490_v45 = vmov 1966171168  }
 0x366   :  { %v485_v46 = vunpack.c.l.s4 %v2490_v45 }
 0x367   :  { %v2778_v4 = vpop.permute.xlu1 %973  ;;  %v2784_v19 = vpop.permute.xlu0 %1418 }
 0x369   :  { %1855 = vrot.lane.b32.xlu1 %v1825_v48, %s2489_s8 }
 0x36b   :  { %v2782_v12 = vpop.permute.xlu1 %985  ;;  %v2788_v29 = vpop.permute.xlu0 %1426 }
 0x36d   :  { %1857 = vrot.lane.b32.xlu1 %v1826_v51, %s2489_s8 }
 0x36f   :  { %v2786_v21 = vpop.permute.xlu1 %1422  ;;  %v2792_v32 = vpop.permute.xlu0 %1410 }
 0x373   :  { %v2790_v30 = vpop.permute.xlu1 %1430  ;;  %v2799_v36 = vpop.permute.xlu0 %1434 }
 0x374   :  { %3334 = vst [vmem:[#allocation39_spill] sm:$0xff] %v2790_v30  ;;  %3335 = vst [vmem:[#allocation40_spill] sm:$0xff] %v2799_v36 }
 0x377   :  { %v2794_v33 = vpop.permute.xlu1 %1414  ;;  %v2806_v42 = vpop.permute.xlu0 %1442 }
 0x378   :  { %3337 = vst [vmem:[#allocation42_spill] sm:$0xff] %v2806_v42 }
 0x37b   :  { %v2801_v37 = vpop.permute.xlu1 %1438  ;;  %v2810_v48 = vpop.permute.xlu0 %1450 }
 0x37c   :  { %3336 = vst [vmem:[#allocation41_spill] sm:$0xff] %v2801_v37  ;;  %3339 = vst [vmem:[#allocation44_spill] sm:$0xff] %v2810_v48 }
 0x37f   :  { %v2808_v43 = vpop.permute.xlu1 %1446 }
 0x380   :  { %3338 = vst [vmem:[#allocation43_spill] sm:$0xff] %v2808_v43 }
 0x383   :  { %v2812_v51 = vpop.permute.xlu1 %1454 }
 0x384   :  { %3340 = vst [vmem:[#allocation45_spill] sm:$0xff] %v2812_v51 }
 0x39e   :  { %v448_v15 = vpop.f32.mrf.mxu1 }
 0x39f   :  { %v449_v16 = vadd.f32 %v2061_v13, %v448_v15 }
 0x3a0   :  { %v2122_v17 = vpop.f32.mrf.mxu1 }
 0x3a1   :  { %v457_v20 = vand.u32 2147483647, %v449_v16 }
 0x3a2   :  { %v451_v22 = vpop.f32.mrf.mxu1 }
 0x3a3   :  { %v459_v23 = vsub.f32 0.0, %v457_v20  ;;  %v452_v24 = vadd.f32 %v2061_v13, %v451_v22  ;;  %v486_v13 = vunpack.c.0.s8 %v485_v46  ;;  %v455_v20 = vmax.f32 %v449_v16, 0.0 }
 0x3a4   :  { %v2123_v25 = vpop.f32.mrf.mxu1 }
 0x3a5   :  { %v461_v26 = vmul.f32 1.442695, %v459_v23  ;;  %v458_v27 = vand.u32 2147483647, %v452_v24  ;;  %v2815_v17 = vsub.s32 %v486_v13, %v2636_v5  ;;  %v2817_v23 = vpop.permute.xlu0 %1458  ;;  %v2819_v25 = vpop.permute.xlu1 %1462 }
 0x3a6   :  { %3341 = vst [vmem:[#allocation46_spill] sm:$0xff] %v2817_v23  ;;  %3342 = vst [vmem:[#allocation47_spill] sm:$0xff] %v2819_v25 }
 0x3a7   :  { %2165 = vpow2.f32 %v461_v26  ;;  %v460_v28 = vsub.f32 0.0, %v458_v27 }
 0x3a9   :  { %v463_v31 = vmul.f32 1.442695, %v460_v28  ;;  %v2827_v45 = vpop.permute.xlu1 %1470 }
 0x3aa   :  { %3344 = vst [vmem:[#allocation49_spill] sm:$0xff] %v2827_v45 }
 0x3ab   :  { %2167 = vpow2.f32 %v463_v31 }
 0x3ad   :  { %v2859_v41 = vpop.permute.xlu1 %997 }
 0x3b4   :  { %v2166_v35 = vpop.eup %2165 }
 0x3b5   :  { %v465_v38 = vadd.f32 1.0, %v2166_v35 }
 0x3b7   :  { %2169 = vlog2.f32 %v465_v38 }
 0x3b8   :  { %v2168_v6 = vpop.eup %2167  ;;  %2171 = vpow2.f32 %v475_v40  ;;  %v456_v40 = vmax.f32 %v452_v24, 0.0 }
 0x3b9   :  { %v466_v14 = vadd.f32 1.0, %v2168_v6 }
 0x3bb   :  { %2173 = vlog2.f32 %v466_v14  ;;  %v2825_v14 = vpop.permute.xlu0 %1466 }
 0x3bc   :  { %2175 = vpow2.f32 %v477_v11  ;;  %3343 = vst [vmem:[#allocation48_spill] sm:$0xff] %v2825_v14 }
 0x3c4   :  { %v2170_v15 = vpop.eup %2169 }
 0x3c5   :  { %v468_v22 = vmul.f32 0.6931472, %v2170_v15  ;;  %v2172_v26 = vpop.eup %2171 }
 0x3c6   :  { %v2829_v46 = vsub.f32 0.0, %v2172_v26 }
 0x3c7   :  { %v471_v27 = vadd.f32 %v468_v22, %v455_v20 }
 0x3c8   :  { %v2174_v28 = vpop.eup %2173 }
 0x3c9   :  { %v2176_v31 = vpop.eup %2175  ;;  %v483_v34 = vcombine.high %v471_v27, %v471_v27  ;;  %v490_v35 = vrot.slane %v471_v27, %v2815_v17  ;;  %v789_v38 = vmul.f32 %v471_v27, %v2672_v9  ;;  %v470_v39 = vmul.f32 0.6931472, %v2174_v28 }
 0x3ca   :  { %v2831_v13 = vsub.f32 0.0, %v2176_v31 }
 0x3cb   :  { %v497_v5 = vrot.slane %v483_v34, %v2815_v17  ;;  %v498_v6 = vcombine.high %v490_v35, %v490_v35  ;;  %v506_v16 = vrot.slane %v490_v35, %v2815_v17  ;;  %v793_v11 = vcombine.high %v789_v38, %v789_v38 }
 0x3cc   :  { %v2834_v15 = vrot.slane %v789_v38, %v2815_v17  ;;  %v2836_v20 = vadd.f32 %v470_v39, %v456_v40 }
 0x3cd   :  { %v499_v24 = vcombine.high %v497_v5, %v497_v5  ;;  %v513_v22 = vrot.slane %v497_v5, %v2815_v17  ;;  %v520_v27 = vrot.slane %v498_v6, %v2815_v17  ;;  %v528_v28 = vcombine.high %v506_v16, %v506_v16 }
 0x3ce   :  { %v584_v34 = vrot.slane %v506_v16, %v2651_v18  ;;  %v807_v35 = vrot.slane %v793_v11, %v2815_v17  ;;  %v808_v26 = vcombine.high %v2834_v15, %v2834_v15  ;;  %v2846_v31 = vrot.slane %v2834_v15, %v2815_v17 }
 0x3cf   :  { %v527_v38 = vrot.slane %v499_v24, %v2815_v17  ;;  %v529_v39 = vcombine.high %v513_v22, %v513_v22  ;;  %v530_v40 = vcombine.high %v520_v27, %v520_v27  ;;  %v588_v5 = vrot.slane %v520_v27, %v2651_v18  ;;  %v2857_v24 = vpop.permute.xlu0 %993 }
 0x3d0   :  { %v592_v6 = vrot.slane %v528_v28, %v2651_v18  ;;  %v600_v7 = vrot.slane %v513_v22, %v2651_v18  ;;  %v661_v16 = vmul.f32 %v584_v34, %v2829_v46  ;;  %v662_v11 = vmul.f32 %v584_v34, %v2831_v13 }
 0x3d1   :  { %v531_v54 = vcombine.high %v527_v38, %v527_v38  ;;  %v596_v53 = vrot.slane %v530_v40, %v2651_v18  ;;  %v604_v15 = vrot.slane %v527_v38, %v2651_v18  ;;  %v608_v45 = vrot.slane %v529_v39, %v2651_v18 }
 0x3d2   :  { %v663_v27 = vmul.f32 %v588_v5, %v2829_v46  ;;  %v664_v28 = vmul.f32 %v588_v5, %v2831_v13  ;;  %v665_v22 = vmul.f32 %v592_v6, %v2829_v46  ;;  %v666_v14 = vmul.f32 %v592_v6, %v2831_v13 }
 0x3d3   :  { %v612_v34 = vrot.slane %v531_v54, %v2651_v18  ;;  %v667_v40 = vmul.f32 %v596_v53, %v2829_v46  ;;  %v668_v38 = vmul.f32 %v596_v53, %v2831_v13  ;;  %v669_v39 = vmul.f32 %v600_v7, %v2829_v46  ;;  %v2876_v55 = vpop.permute.xlu0 %1005 }
 0x3d4   :  { %v670_v56 = vmul.f32 %v600_v7, %v2831_v13  ;;  %v671_v49 = vmul.f32 %v604_v15, %v2829_v46  ;;  %v672_v25 = vmul.f32 %v604_v15, %v2831_v13  ;;  %v673_v5 = vmul.f32 %v608_v45, %v2829_v46  ;;  %v2878_v15 = vpop.permute.xlu1 %1009 }
 0x3d5   :  { %v674_v23 = vmul.f32 %v608_v45, %v2831_v13  ;;  %v675_v6 = vmul.f32 %v612_v34, %v2829_v46  ;;  %v676_v54 = vmul.f32 %v612_v34, %v2831_v13  ;;  %v693_v44 = vmul.f32 1.442695, %v661_v16 }
 0x3d6   :  { %v695_v51 = vmul.f32 1.442695, %v662_v11  ;;  %v697_v48 = vmul.f32 1.442695, %v663_v27  ;;  %v699_v53 = vmul.f32 1.442695, %v664_v28  ;;  %v809_v43 = vcombine.high %v807_v35, %v807_v35 }
 0x3d7   :  { %2177 = vpow2.f32 %v693_v44  ;;  %v701_v42 = vmul.f32 1.442695, %v665_v22  ;;  %v703_v7 = vmul.f32 1.442695, %v666_v14  ;;  %v705_v37 = vmul.f32 1.442695, %v667_v40 }
 0x3d8   :  { %2179 = vpow2.f32 %v695_v51  ;;  %v707_v36 = vmul.f32 1.442695, %v668_v38  ;;  %v709_v45 = vmul.f32 1.442695, %v669_v39  ;;  %v711_v47 = vmul.f32 1.442695, %v670_v56 }
 0x3d9   :  { %2181 = vpow2.f32 %v697_v48  ;;  %v713_v30 = vmul.f32 1.442695, %v671_v49  ;;  %v715_v34 = vmul.f32 1.442695, %v672_v25  ;;  %v717_v16 = vmul.f32 1.442695, %v673_v5  ;;  %v2891_v25 = vpop.permute.xlu0 %1017 }
 0x3da   :  { %2183 = vpow2.f32 %v699_v53  ;;  %v719_v11 = vmul.f32 1.442695, %v674_v23  ;;  %v721_v27 = vmul.f32 1.442695, %v675_v6  ;;  %v2880_v28 = vmul.f32 1.442695, %v676_v54 }
 0x3db   :  { %2185 = vpow2.f32 %v701_v42  ;;  %v823_v44 = vrot.slane %v807_v35, %v2815_v17  ;;  %v830_v14 = vrot.slane %v808_v26, %v2815_v17  ;;  %v837_v22 = vrot.slane %v809_v43, %v2815_v17  ;;  %v2893_v35 = vpop.permute.xlu1 %1021 }
 0x3dc   :  { %2187 = vpow2.f32 %v703_v7  ;;  %v838_v56 = vcombine.high %v2846_v31, %v2846_v31  ;;  %v1086_v49 = vrot.slane %v2846_v31, %v2651_v18  ;;  %v532_v48 = vcombine.high %v2836_v20, %v2836_v20 }
 0x3dd   :  { %2189 = vpow2.f32 %v705_v37  ;;  %v839_v51 = vcombine.high %v823_v44, %v823_v44  ;;  %v840_v23 = vcombine.high %v830_v14, %v830_v14  ;;  %v841_v42 = vcombine.high %v837_v22, %v837_v22 }
 0x3de   :  { %2191 = vpow2.f32 %v707_v36  ;;  %v1090_v43 = vrot.slane %v830_v14, %v2651_v18  ;;  %v1094_v26 = vrot.slane %v838_v56, %v2651_v18  ;;  %v1102_v40 = vrot.slane %v823_v44, %v2651_v18 }
 0x3df   :  { %2193 = vpow2.f32 %v709_v45  ;;  %v1098_v31 = vrot.slane %v840_v23, %v2651_v18  ;;  %v1106_v38 = vrot.slane %v837_v22, %v2651_v18  ;;  %v1110_v37 = vrot.slane %v839_v51, %v2651_v18 }
 0x3e0   :  { %2195 = vpow2.f32 %v711_v47  ;;  %v1114_v39 = vrot.slane %v841_v42, %v2651_v18  ;;  %v1163_v5 = vmul.f32 %v1086_v49, %v2756_v58  ;;  %v1164_v36 = vmul.f32 %v1086_v49, %v2747_v52 }
 0x3e1   :  { %2197 = vpow2.f32 %v713_v30  ;;  %v1165_v6 = vmul.f32 %v1090_v43, %v2752_v50  ;;  %v1166_v54 = vmul.f32 %v1090_v43, %v2758_v59  ;;  %v1167_v53 = vmul.f32 %v1094_v26, %v2760_v60  ;;  %v2918_v60 = vpop.permute.xlu0 %1029 }
 0x3e2   :  { %2199 = vpow2.f32 %v715_v34  ;;  %v1168_v7 = vmul.f32 %v1094_v26, %v2762_v61  ;;  %v1169_v45 = vmul.f32 %v1098_v31, %v2764_v62  ;;  %v1170_v47 = vmul.f32 %v1098_v31, %v2766_v57  ;;  %1195 = vst.msk [vmem:[#allocation4] sm:$0xff] %vm280_vm1, %v1163_v5  ;;  %1196 = vst.msk [vmem:[#allocation4 + $0x8] sm:$0xff] %vm280_vm1, %v1164_v36  ;;  %v2920_v61 = vpop.permute.xlu1 %1033  ;;  %v1914_v34 = vld [vmem:[#allocation21 + $0x38] sm:$0xff] }
 0x3e3   :  { %2201 = vpow2.f32 %v717_v16  ;;  %v1171_v52 = vmul.f32 %v1102_v40, %v2768_v63  ;;  %v1172_v50 = vmul.f32 %v1102_v40, %v2770_v0  ;;  %v1173_v58 = vmul.f32 %v1106_v38, %v2772_v1  ;;  %1197 = vst.msk [vmem:[#allocation4 + $0x10] sm:$0xff] %vm280_vm1, %v1165_v6  ;;  %1198 = vst.msk [vmem:[#allocation4 + $0x18] sm:$0xff] %vm280_vm1, %v1166_v54 }
 0x3e4   :  { %1199 = vst.msk [vmem:[#allocation4 + $0x20] sm:$0xff] %vm280_vm1, %v1167_v53  ;;  %v2178_v59 = vpop.eup %2177  ;;  %2203 = vpow2.f32 %v719_v11  ;;  %v1174_v62 = vmul.f32 %v1106_v38, %v2774_v2  ;;  %v1175_v57 = vmul.f32 %v1110_v37, %v2776_v3  ;;  %v1176_v63 = vmul.f32 %v1110_v37, %v2778_v4  ;;  %1200 = vst.msk [vmem:[#allocation4 + $0x28] sm:$0xff] %vm280_vm1, %v1168_v7 }
 0x3e5   :  { %1201 = vst.msk [vmem:[#allocation4 + $0x30] sm:$0xff] %vm280_vm1, %v1169_v45  ;;  %1202 = vst.msk [vmem:[#allocation4 + $0x38] sm:$0xff] %vm280_vm1, %v1170_v47  ;;  %v2180_v0 = vpop.eup %2179  ;;  %2205 = vpow2.f32 %v721_v27  ;;  %v1177_v1 = vmul.f32 %v1114_v39, %v2780_v8  ;;  %v1178_v30 = vmul.f32 %v1114_v39, %v2782_v12  ;;  %v539_v2 = vrot.slane %v2836_v20, %v2815_v17  ;;  %v1913_v12 = vld [vmem:[#allocation21 + $0x30] sm:$0xff]  ;;  %v2961_v43 = vpop.permute.xlu0 %1041 }
 0x3e6   :  { %757 = vst.msk [vmem:[#allocation3] sm:$0xff] %vm280_vm1, %v2178_v59  ;;  %1203 = vst.msk [vmem:[#allocation4 + $0x40] sm:$0xff] %vm280_vm1, %v1171_v52  ;;  %v2182_v3 = vpop.eup %2181  ;;  %2207 = vpow2.f32 %v2880_v28  ;;  %v546_v4 = vrot.slane %v532_v48, %v2815_v17  ;;  %v2944_v8 = vmul.f32 %v2836_v20, %v2674_v10  ;;  %v1918_v23 = vpack.c.bf16 %v1914_v34, %v1913_v12  ;;  %v2964_v26 = vpop.permute.xlu1 %1045 }
 0x3e7   :  { %1204 = vst.msk [vmem:[#allocation4 + $0x48] sm:$0xff] %vm280_vm1, %v1172_v50  ;;  %1205 = vst.msk [vmem:[#allocation4 + $0x50] sm:$0xff] %vm280_vm1, %v1173_v58  ;;  %v2184_v16 = vpop.eup %2183  ;;  %v547_v11 = vcombine.high %v539_v2, %v539_v2  ;;  %v555_v27 = vrot.slane %v539_v2, %v2815_v17  ;;  %v3345_v58 = vmov 0.0  }
 0x3e8   :  { %758 = vst.msk [vmem:[#allocation3 + $0x8] sm:$0xff] %vm280_vm1, %v2180_v0  ;;  %1206 = vst.msk [vmem:[#allocation4 + $0x58] sm:$0xff] %vm280_vm1, %v1174_v62  ;;  %v2186_v28 = vpop.eup %2185  ;;  %v548_v44 = vcombine.high %v546_v4, %v546_v4  ;;  %v562_v14 = vrot.slane %v546_v4, %v2815_v17  ;;  %v2954_v20 = vrot.slane %v2944_v8, %v2815_v17  ;;  %2125 = vmatpush3.bf16.msra.mxu1 %v1918_v23 }
 0x3e9   :  { %1207 = vst.msk [vmem:[#allocation4 + $0x60] sm:$0xff] %vm280_vm1, %v1175_v57  ;;  %1208 = vst.msk [vmem:[#allocation4 + $0x68] sm:$0xff] %vm280_vm1, %v1176_v63  ;;  %v842_v22 = vcombine.high %v2944_v8, %v2944_v8  ;;  %v2188_v56 = vpop.eup %2187  ;;  %v569_v49 = vrot.slane %v547_v11, %v2815_v17  ;;  %v577_v48 = vcombine.high %v555_v27, %v555_v27  ;;  %2126 = vmatprep.subr.bf16.mxu1 %v3345_v58  ;;  %v1236_v11 = vld [vmem:[#allocation4 + $0x8] sm:$0xff] }
 0x3ea   :  { %759 = vst.msk [vmem:[#allocation3 + $0x10] sm:$0xff] %vm280_vm1, %v2182_v3  ;;  %1209 = vst.msk [vmem:[#allocation4 + $0x70] sm:$0xff] %vm280_vm1, %v1177_v1  ;;  %v616_v51 = vrot.slane %v555_v27, %v2651_v18  ;;  %v2190_v42 = vpop.eup %2189  ;;  %v576_v40 = vrot.slane %v548_v44, %v2815_v17  ;;  %v578_v31 = vcombine.high %v562_v14, %v562_v14  ;;  %v1235_v3 = vld [vmem:[#allocation4] sm:$0xff] }
 0x3eb   :  { %1210 = vst.msk [vmem:[#allocation4 + $0x78] sm:$0xff] %vm280_vm1, %v1178_v30  ;;  %760 = vst.msk [vmem:[#allocation3 + $0x18] sm:$0xff] %vm280_vm1, %v2184_v16  ;;  %v632_v38 = vrot.slane %v562_v14, %v2651_v18  ;;  %v857_v37 = vcombine.high %v2954_v20, %v2954_v20  ;;  %v2192_v39 = vpop.eup %2191  ;;  %v579_v5 = vcombine.high %v569_v49, %v569_v49 }
 0x3ec   :  { %761 = vst.msk [vmem:[#allocation3 + $0x20] sm:$0xff] %vm280_vm1, %v2186_v28  ;;  %762 = vst.msk [vmem:[#allocation3 + $0x28] sm:$0xff] %vm280_vm1, %v2188_v56  ;;  %v620_v36 = vrot.slane %v569_v49, %v2651_v18  ;;  %v624_v6 = vrot.slane %v577_v48, %v2651_v18  ;;  %v677_v54 = vmul.f32 %v616_v51, %v2829_v46  ;;  %v2194_v53 = vpop.eup %2193  ;;  %v2993_v49 = vpop.permute.xlu0 %1053 }
 0x3ed   :  { %763 = vst.msk [vmem:[#allocation3 + $0x30] sm:$0xff] %vm280_vm1, %v2190_v42  ;;  %764 = vst.msk [vmem:[#allocation3 + $0x38] sm:$0xff] %vm280_vm1, %v2192_v39  ;;  %v1227_v7 = vld [vmem:[#allocation3] sm:$0xff]  ;;  %v580_v45 = vcombine.high %v576_v40, %v576_v40  ;;  %v636_v47 = vrot.slane %v576_v40, %v2651_v18  ;;  %v640_v52 = vrot.slane %v578_v31, %v2651_v18  ;;  %v2196_v59 = vpop.eup %2195  ;;  %v3001_v40 = vpop.permute.xlu1 %1057 }
 0x3ee   :  { %v678_v50 = vmul.f32 %v616_v51, %v2831_v13  ;;  %765 = vst.msk [vmem:[#allocation3 + $0x40] sm:$0xff] %vm280_vm1, %v2194_v53  ;;  %v1231_v57 = vmul.f32 0.0, %v1227_v7  ;;  %v628_v63 = vrot.slane %v579_v5, %v2651_v18  ;;  %v679_v0 = vmul.f32 %v620_v36, %v2829_v46  ;;  %v2198_v30 = vpop.eup %2197  ;;  %766 = vst.msk [vmem:[#allocation3 + $0x48] sm:$0xff] %vm280_vm1, %v2196_v59 }
 0x3ef   :  { %v1228_v62 = vld [vmem:[#allocation3 + $0x8] sm:$0xff]  ;;  %v680_v1 = vmul.f32 %v620_v36, %v2831_v13  ;;  %v644_v4 = vrot.slane %v580_v45, %v2651_v18  ;;  %v681_v12 = vmul.f32 %v624_v6, %v2829_v46  ;;  %v682_v34 = vmul.f32 %v624_v6, %v2831_v13  ;;  %v2200_v16 = vpop.eup %2199  ;;  %767 = vst.msk [vmem:[#allocation3 + $0x50] sm:$0xff] %vm280_vm1, %v2198_v30 }
 0x3f0   :  { %v1232_v2 = vmul.f32 0.0, %v1228_v62  ;;  %v2988_v27 = vadd.f32 %v1235_v3, %v1231_v57  ;;  %v683_v28 = vmul.f32 %v628_v63, %v2829_v46  ;;  %v684_v44 = vmul.f32 %v628_v63, %v2831_v13  ;;  %v2202_v56 = vpop.eup %2201  ;;  %768 = vst.msk [vmem:[#allocation3 + $0x58] sm:$0xff] %vm280_vm1, %v2200_v16  ;;  %v3021_v3 = vpop.permute.xlu0 %1065 }
 0x3f1   :  { %v685_v14 = vmul.f32 %v632_v38, %v2829_v46  ;;  %v686_v51 = vmul.f32 %v632_v38, %v2831_v13  ;;  %v687_v23 = vmul.f32 %v636_v47, %v2829_v46  ;;  %v688_v42 = vmul.f32 %v636_v47, %v2831_v13  ;;  %v2204_v31 = vpop.eup %2203  ;;  %769 = vst.msk [vmem:[#allocation3 + $0x60] sm:$0xff] %vm280_vm1, %v2202_v56  ;;  %v1229_v63 = vld [vmem:[#allocation3 + $0x10] sm:$0xff] }
 0x3f2   :  { %v2996_v48 = vadd.f32 %v1236_v11, %v1232_v2  ;;  %1243 = vst.msk [vmem:[#allocation5] sm:$0xff] %vm280_vm1, %v2988_v27  ;;  %v689_v39 = vmul.f32 %v640_v52, %v2829_v46  ;;  %v690_v5 = vmul.f32 %v640_v52, %v2831_v13  ;;  %v691_v36 = vmul.f32 %v644_v4, %v2829_v46  ;;  %v2206_v6 = vpop.eup %2205 }
 0x3f3   :  { %v692_v38 = vmul.f32 %v644_v4, %v2831_v13  ;;  %770 = vst.msk [vmem:[#allocation3 + $0x68] sm:$0xff] %vm280_vm1, %v2204_v31  ;;  %v725_v53 = vmul.f32 1.442695, %v677_v54  ;;  %v727_v7 = vmul.f32 1.442695, %v678_v50  ;;  %v865_v47 = vrot.slane %v2954_v20, %v2815_v17  ;;  %v2208_v59 = vpop.eup %2207  ;;  %771 = vst.msk [vmem:[#allocation3 + $0x70] sm:$0xff] %vm280_vm1, %v2206_v6  ;;  %v3025_v20 = vpop.permute.xlu1 %1069 }
 0x3f4   :  { %1244 = vst.msk [vmem:[#allocation5 + $0x8] sm:$0xff] %vm280_vm1, %v2996_v48  ;;  %v729_v45 = vmul.f32 1.442695, %v679_v0  ;;  %v731_v52 = vmul.f32 1.442695, %v680_v1  ;;  %v879_v13 = vrot.slane %v857_v37, %v2815_v17  ;;  %772 = vst.msk [vmem:[#allocation3 + $0x78] sm:$0xff] %vm280_vm1, %v2208_v59 }
 0x3f5   :  { %v733_v62 = vmul.f32 1.442695, %v681_v12  ;;  %v735_v46 = vmul.f32 1.442695, %v682_v34  ;;  %2209 = vpow2.f32 %v725_v53  ;;  %v737_v54 = vmul.f32 1.442695, %v683_v28 }
 0x3f6   :  { %v739_v50 = vmul.f32 1.442695, %v684_v44  ;;  %v741_v57 = vmul.f32 1.442695, %v685_v14  ;;  %2211 = vpow2.f32 %v727_v7  ;;  %v743_v0 = vmul.f32 1.442695, %v686_v51 }
 0x3f7   :  { %v745_v30 = vmul.f32 1.442695, %v687_v23  ;;  %v747_v2 = vmul.f32 1.442695, %v688_v42  ;;  %2213 = vpow2.f32 %v729_v45  ;;  %v749_v1 = vmul.f32 1.442695, %v689_v39 }
 0x3f8   :  { %v751_v4 = vmul.f32 1.442695, %v690_v5  ;;  %v3023_v12 = vmul.f32 1.442695, %v691_v36  ;;  %2215 = vpow2.f32 %v731_v52  ;;  %v3027_v37 = vmul.f32 1.442695, %v692_v38 }
 0x3f9   :  { %v887_v34 = vcombine.high %v865_v47, %v865_v47  ;;  %v889_v16 = vcombine.high %v879_v13, %v879_v13  ;;  %2217 = vpow2.f32 %v733_v62  ;;  %v1118_v11 = vrot.slane %v865_v47, %v2651_v18  ;;  %v1248_v6 = vld [vmem:[#allocation3 + $0x20] sm:$0xff]  ;;  %v1250_v7 = vld [vmem:[#allocation3 + $0x30] sm:$0xff] }
 0x3fa   :  { %v1122_v28 = vrot.slane %v879_v13, %v2651_v18  ;;  %v856_v44 = vrot.slane %v842_v22, %v2815_v17  ;;  %2219 = vpow2.f32 %v735_v46  ;;  %v1233_v51 = vmul.f32 0.0, %v1229_v63  ;;  %v1230_v22 = vld [vmem:[#allocation3 + $0x18] sm:$0xff]  ;;  %v3063_v63 = vld [vmem:[#allocation21 + $0x20] sm:$0xff] }
 0x3fb   :  { %v1126_v14 = vrot.slane %v887_v34, %v2651_v18  ;;  %v1130_v56 = vrot.slane %v889_v16, %v2651_v18  ;;  %2221 = vpow2.f32 %v737_v54  ;;  %v1179_v23 = vmul.f32 %v1118_v11, %v2857_v24  ;;  %v1237_v24 = vld [vmem:[#allocation4 + $0x10] sm:$0xff]  ;;  %v1537_v16 = vld [vmem:[#allocation5 + $0x8] sm:$0xff] }
 0x3fc   :  { %v1180_v42 = vmul.f32 %v1118_v11, %v2859_v41  ;;  %v1181_v31 = vmul.f32 %v1122_v28, %v2876_v55  ;;  %2223 = vpow2.f32 %v739_v50  ;;  %v1182_v39 = vmul.f32 %v1122_v28, %v2878_v15  ;;  %v1078_v55 = vpop.permute.xlu0 %1077  ;;  %v1082_v15 = vpop.permute.xlu1 %1081  ;;  %v1259_v34 = vld [vmem:[#allocation4 + $0x30] sm:$0xff]  ;;  %v1238_v28 = vld [vmem:[#allocation4 + $0x18] sm:$0xff] }
 0x3fd   :  { %v1183_v5 = vmul.f32 %v1126_v14, %v2891_v25  ;;  %v1184_v8 = vmul.f32 %v1126_v14, %v2893_v35  ;;  %2225 = vpow2.f32 %v741_v57  ;;  %v1185_v36 = vmul.f32 %v1130_v56, %v2918_v60  ;;  %1211 = vst.msk [vmem:[#allocation4 + $0x80] sm:$0xff] %vm280_vm1, %v1179_v23  ;;  %v1258_v23 = vld [vmem:[#allocation4 + $0x28] sm:$0xff] }
 0x3fe   :  { %v1186_v38 = vmul.f32 %v1130_v56, %v2920_v61  ;;  %1212 = vst.msk [vmem:[#allocation4 + $0x88] sm:$0xff] %vm280_vm1, %v1180_v42  ;;  %1213 = vst.msk [vmem:[#allocation4 + $0x90] sm:$0xff] %vm280_vm1, %v1181_v31  ;;  %v858_v41 = vcombine.high %v856_v44, %v856_v44  ;;  %2227 = vpow2.f32 %v743_v0  ;;  %v872_v25 = vrot.slane %v856_v44, %v2815_v17  ;;  %v1249_v61 = vld [vmem:[#allocation3 + $0x28] sm:$0xff]  ;;  %v1273_v56 = vld [vmem:[#allocation3 + $0x50] sm:$0xff] }
 0x3ff   :  { %1214 = vst.msk [vmem:[#allocation4 + $0x98] sm:$0xff] %vm280_vm1, %v1182_v39  ;;  %1215 = vst.msk [vmem:[#allocation4 + $0xa0] sm:$0xff] %vm280_vm1, %v1183_v5  ;;  %v1241_v35 = vadd.f32 %v1237_v24, %v1233_v51  ;;  %v1252_v60 = vmul.f32 %v1248_v6, %v2988_v27  ;;  %2229 = vpow2.f32 %v745_v30  ;;  %v1234_v45 = vmul.f32 0.0, %v1230_v22  ;;  %v1257_v27 = vld [vmem:[#allocation4 + $0x20] sm:$0xff]  ;;  %v1912_v44 = vld [vmem:[#allocation21 + $0x28] sm:$0xff] }
 0x400   :  { %1216 = vst.msk [vmem:[#allocation4 + $0xa8] sm:$0xff] %vm280_vm1, %v1184_v8  ;;  %1217 = vst.msk [vmem:[#allocation4 + $0xb0] sm:$0xff] %vm280_vm1, %v1185_v36  ;;  %v886_v53 = vrot.slane %v858_v41, %v2815_v17  ;;  %v1253_v47 = vmul.f32 %v1249_v61, %v2996_v48  ;;  %2231 = vpow2.f32 %v747_v2  ;;  %v888_v59 = vcombine.high %v872_v25, %v872_v25  ;;  %v3084_v42 = vld [vmem:[#allocation21 + $0x10] sm:$0xff]  ;;  %v1280_v5 = vld [vmem:[#allocation4 + $0x40] sm:$0xff] }
 0x401   :  { %1218 = vst.msk [vmem:[#allocation4 + $0xb8] sm:$0xff] %vm280_vm1, %v1186_v38  ;;  %v1134_v52 = vrot.slane %v872_v25, %v2651_v18  ;;  %1245 = vst.msk [vmem:[#allocation5 + $0x10] sm:$0xff] %vm280_vm1, %v1241_v35  ;;  %v1254_v62 = vmul.f32 %v1250_v7, %v1241_v35  ;;  %2233 = vpow2.f32 %v749_v1  ;;  %v1261_v54 = vadd.f32 %v1257_v27, %v1252_v60  ;;  %v1251_v8 = vld [vmem:[#allocation3 + $0x38] sm:$0xff]  ;;  %v1282_v24 = vld [vmem:[#allocation4 + $0x50] sm:$0xff] }
 0x402   :  { %v1138_v46 = vrot.slane %v886_v53, %v2651_v18  ;;  %v890_v13 = vcombine.high %v886_v53, %v886_v53  ;;  %v2210_v50 = vpop.eup %2209  ;;  %2235 = vpow2.f32 %v751_v4  ;;  %v1142_v17 = vrot.slane %v888_v59, %v2651_v18  ;;  %v3070_v4 = vpop.permute.xlu0 %1482  ;;  %v3092_v41 = vld [vmem:[#allocation21 + $0x18] sm:$0xff]  ;;  %v1272_v25 = vld [vmem:[#allocation3 + $0x48] sm:$0xff]  ;;  %v1296_v59 = vld [vmem:[#allocation3 + $0x70] sm:$0xff] }
 0x403   :  { %v1187_v57 = vmul.f32 %v1134_v52, %v2961_v43  ;;  %v1188_v48 = vmul.f32 %v1134_v52, %v2964_v26  ;;  %v2212_v0 = vpop.eup %2211  ;;  %2237 = vpow2.f32 %v3023_v12  ;;  %773 = vst.msk [vmem:[#allocation3 + $0x80] sm:$0xff] %vm280_vm1, %v2210_v50  ;;  %1266 = vst.msk [vmem:[#allocation5 + $0x20] sm:$0xff] %vm280_vm1, %v1261_v54  ;;  %v3073_v43 = vpop.permute.xlu1 %1486  ;;  %v1536_v26 = vld [vmem:[#allocation5] sm:$0xff]  ;;  %v1262_v22 = vadd.f32 %v1258_v23, %v1253_v47  ;;  %v1260_v61 = vld [vmem:[#allocation4 + $0x38] sm:$0xff] }
 0x404   :  { %v1189_v30 = vmul.f32 %v1138_v46, %v2993_v49  ;;  %v1190_v2 = vmul.f32 %v1138_v46, %v3001_v40  ;;  %v1146_v1 = vrot.slane %v890_v13, %v2651_v18  ;;  %v2214_v11 = vpop.eup %2213  ;;  %2239 = vpow2.f32 %v3027_v37  ;;  %774 = vst.msk [vmem:[#allocation3 + $0x88] sm:$0xff] %vm280_vm1, %v2212_v0  ;;  %v1271_v12 = vld [vmem:[#allocation3 + $0x40] sm:$0xff]  ;;  %v1281_v13 = vld [vmem:[#allocation4 + $0x48] sm:$0xff]  ;;  %v1274_v0 = vld [vmem:[#allocation3 + $0x58] sm:$0xff] }
 0x405   :  { %v1191_v49 = vmul.f32 %v1142_v17, %v3021_v3  ;;  %v1192_v40 = vmul.f32 %v1142_v17, %v3025_v20  ;;  %1219 = vst.msk [vmem:[#allocation4 + $0xc0] sm:$0xff] %vm280_vm1, %v1187_v57  ;;  %1220 = vst.msk [vmem:[#allocation4 + $0xc8] sm:$0xff] %vm280_vm1, %v1188_v48  ;;  %v1263_v18 = vadd.f32 %v1259_v34, %v1254_v62  ;;  %v2216_v14 = vpop.eup %2215  ;;  %v1294_v60 = vld [vmem:[#allocation3 + $0x60] sm:$0xff] }
 0x406   :  { %775 = vst.msk [vmem:[#allocation3 + $0x90] sm:$0xff] %vm280_vm1, %v2214_v11  ;;  %1221 = vst.msk [vmem:[#allocation4 + $0xd0] sm:$0xff] %vm280_vm1, %v1189_v30  ;;  %v1193_v37 = vmul.f32 %v1146_v1, %v1078_v55  ;;  %v1194_v3 = vmul.f32 %v1146_v1, %v1082_v15  ;;  %v1275_v51 = vmul.f32 %v1271_v12, %v1261_v54  ;;  %v2218_v31 = vpop.eup %2217  ;;  %v3105_v52 = vpop.permute.xlu0 %1490  ;;  %v3116_v1 = vld [vmem:[#allocation21 + $0x8] sm:$0xff] }
 0x407   :  { %1222 = vst.msk [vmem:[#allocation4 + $0xd8] sm:$0xff] %vm280_vm1, %v1190_v2  ;;  %v1242_v20 = vadd.f32 %v1238_v28, %v1234_v45  ;;  %776 = vst.msk [vmem:[#allocation3 + $0x98] sm:$0xff] %vm280_vm1, %v2216_v14  ;;  %v1277_v39 = vmul.f32 %v1273_v56, %v1263_v18  ;;  %v1568_v36 = vmul.f32 %v1536_v26, %v2792_v32  ;;  %v2220_v55 = vpop.eup %2219  ;;  %v3102_v45 = vld [vmem:[#allocation21] sm:$0xff]  ;;  %v3108_v46 = vpop.permute.xlu1 %1494  ;;  %v1305_v26 = vld [vmem:[#allocation4 + $0x70] sm:$0xff] }
 0x408   :  { %1223 = vst.msk [vmem:[#allocation4 + $0xe0] sm:$0xff] %vm280_vm1, %v1191_v49  ;;  %1224 = vst.msk [vmem:[#allocation4 + $0xe8] sm:$0xff] %vm280_vm1, %v1192_v40  ;;  %v1569_v38 = vmul.f32 %v1537_v16, %v2794_v33  ;;  %v1284_v15 = vadd.f32 %v1280_v5, %v1275_v51  ;;  %v1917_v35 = vpack.c.bf16 %v1912_v44, %v3063_v63  ;;  %v2222_v32 = vpop.eup %2221  ;;  %v1538_v54 = vld [vmem:[#allocation5 + $0x10] sm:$0xff]  ;;  %v1303_v63 = vld [vmem:[#allocation4 + $0x60] sm:$0xff] }
 0x409   :  { %1268 = vst.msk [vmem:[#allocation5 + $0x30] sm:$0xff] %vm280_vm1, %v1263_v18  ;;  %777 = vst.msk [vmem:[#allocation3 + $0xa0] sm:$0xff] %vm280_vm1, %v2218_v31  ;;  %v1255_v6 = vmul.f32 %v1251_v8, %v1242_v20  ;;  %v1286_v33 = vadd.f32 %v1282_v24, %v1277_v39  ;;  %v1276_v53 = vmul.f32 %v1272_v25, %v1262_v22  ;;  %v1600_v7 = vsel %vm280_vm1, %v1568_v36, 0.0  ;;  %v2224_v47 = vpop.eup %2223  ;;  %v1295_v49 = vld [vmem:[#allocation3 + $0x68] sm:$0xff]  ;;  %v1283_v44 = vld [vmem:[#allocation4 + $0x58] sm:$0xff] }
 0x40a   :  { %1225 = vst.msk [vmem:[#allocation4 + $0xf0] sm:$0xff] %vm280_vm1, %v1193_v37  ;;  %1226 = vst.msk [vmem:[#allocation4 + $0xf8] sm:$0xff] %vm280_vm1, %v1194_v3  ;;  %v1298_v62 = vmul.f32 %v1294_v60, %v1284_v15  ;;  %v1601_v50 = vsel %vm280_vm1, %v1569_v38, 0.0  ;;  %2127 = vmatpush3.bf16.msra.mxu1 %v1917_v35  ;;  %v1916_v17 = vpack.c.bf16 %v3092_v41, %v3084_v42  ;;  %v2226_v57 = vpop.eup %2225  ;;  %v3123_v18 = vld [vmem:[%s3319_s10] ss:$0 sm:$0xff]  ;;  %v1317_v28 = vld [vmem:[#allocation3 + $0x80] sm:$0xff] }
 0x40b   :  { %1246 = vst.msk [vmem:[#allocation5 + $0x18] sm:$0xff] %vm280_vm1, %v1242_v20  ;;  %778 = vst.msk [vmem:[#allocation3 + $0xa8] sm:$0xff] %vm280_vm1, %v2220_v55  ;;  %v1264_v27 = vadd.f32 %v1260_v61, %v1255_v6  ;;  %v1300_v48 = vmul.f32 %v1296_v59, %v1286_v33  ;;  %v1285_v30 = vadd.f32 %v1281_v13, %v1276_v53  ;;  %2128 = vmatprep.subr.bf16.mxu1 %v3345_v58  ;;  %v2228_v34 = vpop.eup %2227  ;;  %v1304_v42 = vld [vmem:[#allocation4 + $0x68] sm:$0xff]  ;;  %v1297_v8 = vld [vmem:[#allocation3 + $0x78] sm:$0xff]  ;;  %v3143_v6 = vpop.permute.xlu0 %1474  ;;  %s2491_s10 = smov [#allocation23]  }
 0x40c   :  { %1267 = vst.msk [vmem:[#allocation5 + $0x28] sm:$0xff] %vm280_vm1, %v1262_v22  ;;  %779 = vst.msk [vmem:[#allocation3 + $0xb0] sm:$0xff] %vm280_vm1, %v2222_v32  ;;  %v1602_v2 = vadd.f32 %v1601_v50, %v1600_v7  ;;  %v1307_v16 = vadd.f32 %v1303_v63, %v1298_v62  ;;  %v2230_v40 = vpop.eup %2229  ;;  %v1570_v37 = vmul.f32 %v1538_v54, %v2784_v19  ;;  %v1326_v19 = vld [vmem:[#allocation4 + $0x80] sm:$0xff]  ;;  %v1328_v55 = vld [vmem:[#allocation4 + $0x90] sm:$0xff]  ;;  %v3145_v35 = vpop.permute.xlu1 %1478  ;;  %s2040_s18 = sshll.u32 %s2491_s10, 4  ;;  %s2041_s18 = int_to_ptr.vmem [resolvable:$true] %s2040_s18 }
 0x40d   :  { %1289 = vst.msk [vmem:[#allocation5 + $0x40] sm:$0xff] %vm280_vm1, %v1284_v15  ;;  %780 = vst.msk [vmem:[#allocation3 + $0xb8] sm:$0xff] %vm280_vm1, %v2224_v47  ;;  %v1278_v11 = vmul.f32 %v1274_v0, %v1264_v27  ;;  %v1309_v12 = vadd.f32 %v1305_v26, %v1300_v48  ;;  %v1299_v14 = vmul.f32 %v1295_v49, %v1285_v30  ;;  %v2232_v3 = vpop.eup %2231  ;;  %v1319_v51 = vld [vmem:[#allocation3 + $0x90] sm:$0xff]  ;;  %v1318_v25 = vld [vmem:[#allocation3 + $0x88] sm:$0xff]  ;;  %s2441_s19 = scalar_lea.vmem %s2041_s18, 256  ;;  %p2446_p9 = scmp.lt.s32.totalorder %s2041_s18, %s2041_s18 }
 0x40e   :  { %1291 = vst.msk [vmem:[#allocation5 + $0x50] sm:$0xff] %vm280_vm1, %v1286_v33  ;;  %781 = vst.msk [vmem:[#allocation3 + $0xc0] sm:$0xff] %vm280_vm1, %v2226_v57  ;;  %v1603_v56 = vrot.slane %v1602_v2, 4  ;;  %v1321_v20 = vmul.f32 %v1317_v28, %v1307_v16  ;;  %2129 = vmatpush3.bf16.msra.mxu1 %v1916_v17  ;;  %v1915_v31 = vpack.c.bf16 %v3116_v1, %v3102_v45  ;;  %v2234_v39 = vpop.eup %2233  ;;  %v1609_v7 = vsel %vm280_vm1, %v1570_v37, 0.0  ;;  %v1327_v62 = vld [vmem:[#allocation4 + $0x88] sm:$0xff]  ;;  %v1349_v13 = vld [vmem:[#allocation4 + $0xa0] sm:$0xff]  ;;  %p2442_p8 = scmp.ne.s32.totalorder %s2041_s18, %s2441_s19  ;;  %p2447_p10 = scmp.lt.s32.totalorder %s2441_s19, %s2441_s19 }
 0x40f   :  { %1269 = vst.msk [vmem:[#allocation5 + $0x38] sm:$0xff] %vm280_vm1, %v1264_v27  ;;  %782 = vst.msk [vmem:[#allocation3 + $0xc8] sm:$0xff] %vm280_vm1, %v2228_v34  ;;  %v1287_v23 = vadd.f32 %v1283_v44, %v1278_v11  ;;  %v1323_v5 = vmul.f32 %v1319_v51, %v1309_v12  ;;  %v1308_v22 = vadd.f32 %v1304_v42, %v1299_v14  ;;  %2130 = vmatprep.subr.bf16.mxu1 %v3345_v58  ;;  %v2236_v38 = vpop.eup %2235  ;;  %v1320_v54 = vld [vmem:[#allocation3 + $0x98] sm:$0xff]  ;;  %v3162_v28 = vpop.permute.xlu0 %1498 }
 0x410   :  { %1290 = vst.msk [vmem:[#allocation5 + $0x48] sm:$0xff] %vm280_vm1, %v1285_v30  ;;  %783 = vst.msk [vmem:[#allocation3 + $0xd0] sm:$0xff] %vm280_vm1, %v2230_v40  ;;  %v3134_v36 = vadd.f32 %v1603_v56, %v1602_v2  ;;  %v3139_v41 = vmul.f32 %v3123_v18, %v2672_v9  ;;  %v1330_v24 = vadd.f32 %v1326_v19, %v1321_v20  ;;  %v2238_v33 = vpop.eup %2237  ;;  %v1340_v60 = vld [vmem:[#allocation3 + $0xa0] sm:$0xff]  ;;  %v1306_v9 = vld [vmem:[#allocation4 + $0x78] sm:$0xff]  ;;  %v3164_v14 = vpop.permute.xlu1 %1502  ;;  %p2448_p11 = por %p2447_p10, %p2446_p9 }
 0x411   :  { %1312 = vst.msk [vmem:[#allocation5 + $0x60] sm:$0xff] %vm280_vm1, %v1307_v16  ;;  %784 = vst.msk [vmem:[#allocation3 + $0xd8] sm:$0xff] %vm280_vm1, %v2232_v3  ;;  %v1301_v15 = vmul.f32 %v1297_v8, %v1287_v23  ;;  %v1332_v58 = vadd.f32 %v1328_v55, %v1323_v5  ;;  %v1322_v61 = vmul.f32 %v1318_v25, %v1308_v22  ;;  %v2240_v45 = vpop.eup %2239  ;;  %v1351_v30 = vld [vmem:[#allocation4 + $0xb0] sm:$0xff]  ;;  %v1329_v1 = vld [vmem:[#allocation4 + $0x98] sm:$0xff] }
 0x412   :  { %1314 = vst.msk [vmem:[#allocation5 + $0x70] sm:$0xff] %vm280_vm1, %v1309_v12  ;;  %785 = vst.msk [vmem:[#allocation3 + $0xe0] sm:$0xff] %vm280_vm1, %v2234_v39  ;;  %v1539_v32 = vld [vmem:[#allocation5 + $0x18] sm:$0xff]  ;;  %v1344_v47 = vmul.f32 %v1340_v60, %v1330_v24  ;;  %2131 = vmatpush3.bf16.msra.mxu1 %v1915_v31  ;;  %v1605_v17 = vrot.slane %v3134_v36, 2  ;;  %v1341_v0 = vld [vmem:[#allocation3 + $0xa8] sm:$0xff]  ;;  %v1755_v11 = vrot.slane %v3139_v41, 1  ;;  %v3172_v5 = vmul.f32 %v3123_v18, %v2674_v10  ;;  %p2449_p12 = pnand %p2448_p11, %p2442_p8 }
 0x413   :  { %1292 = vst.msk [vmem:[#allocation5 + $0x58] sm:$0xff] %vm280_vm1, %v1287_v23  ;;  %786 = vst.msk [vmem:[#allocation3 + $0xe8] sm:$0xff] %vm280_vm1, %v2236_v38  ;;  %v1571_v53 = vmul.f32 %v1539_v32, %v2786_v21  ;;  %v1310_v59 = vadd.f32 %v1306_v9, %v1301_v15  ;;  %v1342_v27 = vld [vmem:[#allocation3 + $0xb0] sm:$0xff]  ;;  %v1331_v50 = vadd.f32 %v1327_v62, %v1322_v61  ;;  %v1756_v49 = vrot.slane %v3139_v41, 2  ;;  %v1350_v12 = vld [vmem:[#allocation4 + $0xa8] sm:$0xff] }
 0x414   :  { %1313 = vst.msk [vmem:[#allocation5 + $0x68] sm:$0xff] %vm280_vm1, %v1308_v22  ;;  %787 = vst.msk [vmem:[#allocation3 + $0xf0] sm:$0xff] %vm280_vm1, %v2238_v33  ;;  %v1346_v21 = vmul.f32 %v1342_v27, %v1332_v58  ;;  %v1353_v48 = vadd.f32 %v1349_v13, %v1344_v47  ;;  %v1757_v3 = vrot.slane %v3139_v41, 3  ;;  %v1372_v20 = vld [vmem:[#allocation4 + $0xc0] sm:$0xff]  ;;  %v1343_v23 = vld [vmem:[#allocation3 + $0xb8] sm:$0xff]  ;;  %v1606_v31 = vadd.f32 %v1605_v17, %v3134_v36 }
 0x415   :  { %1335 = vst.msk [vmem:[#allocation5 + $0x80] sm:$0xff] %vm280_vm1, %v1330_v24  ;;  %788 = vst.msk [vmem:[#allocation3 + $0xf8] sm:$0xff] %vm280_vm1, %v2240_v45  ;;  %v1610_v57 = vsel %vm280_vm1, %v1571_v53, 0.0  ;;  %v1324_v63 = vmul.f32 %v1320_v54, %v1310_v59  ;;  %v1345_v34 = vmul.f32 %v1341_v0, %v1331_v50  ;;  %v1363_v16 = vld [vmem:[#allocation3 + $0xc0] sm:$0xff]  ;;  %v1758_v39 = vrot.slane %v3139_v41, 4  ;;  %v1374_v22 = vld [vmem:[#allocation4 + $0xd0] sm:$0xff] }
 0x416   :  { %1337 = vst.msk [vmem:[#allocation5 + $0x90] sm:$0xff] %vm280_vm1, %v1332_v58  ;;  %1315 = vst.msk [vmem:[#allocation5 + $0x78] sm:$0xff] %vm280_vm1, %v1310_v59  ;;  %v1611_v2 = vadd.f32 %v1610_v57, %v1609_v7  ;;  %v1355_v26 = vadd.f32 %v1351_v30, %v1346_v21  ;;  %v1367_v44 = vmul.f32 %v1363_v16, %v1353_v48  ;;  %v1364_v38 = vld [vmem:[#allocation3 + $0xc8] sm:$0xff]  ;;  %v1540_v24 = vld [vmem:[#allocation5 + $0x20] sm:$0xff]  ;;  %v1759_v58 = vrot.slane %v3139_v41, 5  ;;  %v1507_v57 = vpop.permute.xlu0 %1506 }
 0x417   :  { %1336 = vst.msk [vmem:[#allocation5 + $0x88] sm:$0xff] %vm280_vm1, %v1331_v50  ;;  %1358 = vst.msk [vmem:[#allocation5 + $0xa0] sm:$0xff] %vm280_vm1, %v1353_v48  ;;  %v1333_v40 = vadd.f32 %v1329_v1, %v1324_v63  ;;  %v1365_v37 = vld [vmem:[#allocation3 + $0xd0] sm:$0xff]  ;;  %v1354_v51 = vadd.f32 %v1350_v12, %v1345_v34  ;;  %v1352_v25 = vld [vmem:[#allocation4 + $0xb8] sm:$0xff]  ;;  %v1760_v10 = vrot.slane %v3139_v41, 6  ;;  %v1607_v13 = vrot.slane %v1606_v31, 1  ;;  %v1511_v48 = vpop.permute.xlu1 %1510 }
 0x418   :  { %v1612_v56 = vrot.slane %v1611_v2, 4  ;;  %1360 = vst.msk [vmem:[#allocation5 + $0xb0] sm:$0xff] %vm280_vm1, %v1355_v26  ;;  %v1369_v42 = vmul.f32 %v1365_v37, %v1355_v26  ;;  %v1376_v19 = vadd.f32 %v1372_v20, %v1367_v44  ;;  %v1373_v61 = vld [vmem:[#allocation4 + $0xc8] sm:$0xff]  ;;  %v1395_v59 = vld [vmem:[#allocation4 + $0xe0] sm:$0xff]  ;;  %v1366_v62 = vld [vmem:[#allocation3 + $0xd8] sm:$0xff]  ;;  %v1572_v54 = vmul.f32 %v1540_v24, %v2788_v29 }
 0x419   :  { %1338 = vst.msk [vmem:[#allocation5 + $0x98] sm:$0xff] %vm280_vm1, %v1333_v40  ;;  %v1347_v8 = vmul.f32 %v1343_v23, %v1333_v40  ;;  %1359 = vst.msk [vmem:[#allocation5 + $0xa8] sm:$0xff] %vm280_vm1, %v1354_v51  ;;  %v1368_v36 = vmul.f32 %v1364_v38, %v1354_v51  ;;  %v1386_v33 = vld [vmem:[#allocation3 + $0xe0] sm:$0xff]  ;;  %v1397_v50 = vld [vmem:[#allocation4 + $0xf0] sm:$0xff]  ;;  %v1763_v12 = vrot.slane %v3172_v5, 2 }
 0x41a   :  { %v1613_v55 = vadd.f32 %v1612_v56, %v1611_v2  ;;  %v1378_v32 = vadd.f32 %v1374_v22, %v1369_v42  ;;  %1381 = vst.msk [vmem:[#allocation5 + $0xc0] sm:$0xff] %vm280_vm1, %v1376_v19  ;;  %v1390_v53 = vmul.f32 %v1386_v33, %v1376_v19  ;;  %v1387_v30 = vld [vmem:[#allocation3 + $0xe8] sm:$0xff]  ;;  %v1375_v2 = vld [vmem:[#allocation4 + $0xd8] sm:$0xff]  ;;  %v1608_v42 = vadd.f32 %v1607_v13, %v1606_v31 }
 0x41b   :  { %v1356_v9 = vadd.f32 %v1352_v25, %v1347_v8  ;;  %v1388_v7 = vld [vmem:[#allocation3 + $0xf0] sm:$0xff]  ;;  %v1377_v47 = vadd.f32 %v1373_v61, %v1368_v36  ;;  %v1396_v16 = vld [vmem:[#allocation4 + $0xe8] sm:$0xff]  ;;  %v1618_v19 = vsel %vm280_vm1, %v1572_v54, 0.0 }
 0x41c   :  { %v1552_v15 = vld [vmem:[#allocation5 + $0x80] sm:$0xff]  ;;  %v1614_v45 = vrot.slane %v1613_v55, 2  ;;  %1383 = vst.msk [vmem:[#allocation5 + $0xd0] sm:$0xff] %vm280_vm1, %v1378_v32  ;;  %v1392_v27 = vmul.f32 %v1388_v7, %v1378_v32  ;;  %v1399_v63 = vadd.f32 %v1395_v59, %v1390_v53  ;;  %v1541_v51 = vld [vmem:[#allocation5 + $0x28] sm:$0xff]  ;;  %v3346_v36 = vld [vmem:[#allocation39_spill] sm:$0xff]  ;;  %v1519_v53 = vpop.permute.xlu1 %1518 }
 0x41d   :  { %v1554_v18 = vld [vmem:[#allocation5 + $0x90] sm:$0xff]  ;;  %v1584_v60 = vmul.f32 %v1552_v15, %v3143_v6  ;;  %v1762_v6 = vrot.slane %v3172_v5, 1  ;;  %1361 = vst.msk [vmem:[#allocation5 + $0xb8] sm:$0xff] %vm280_vm1, %v1356_v9  ;;  %v1370_v0 = vmul.f32 %v1366_v62, %v1356_v9  ;;  %1382 = vst.msk [vmem:[#allocation5 + $0xc8] sm:$0xff] %vm280_vm1, %v1377_v47  ;;  %v1573_v33 = vmul.f32 %v1541_v51, %v3346_v36 }
 0x41e   :  { %v1586_v21 = vmul.f32 %v1554_v18, %v3070_v4  ;;  %v1553_v17 = vld [vmem:[#allocation5 + $0x88] sm:$0xff]  ;;  %v1556_v1 = vld [vmem:[#allocation5 + $0xa0] sm:$0xff]  ;;  %v1401_v29 = vadd.f32 %v1397_v50, %v1392_v27  ;;  %v1391_v4 = vmul.f32 %v1387_v30, %v1377_v47  ;;  %1404 = vst.msk [vmem:[#allocation5 + $0xe0] sm:$0xff] %vm280_vm1, %v1399_v63  ;;  %v1615_v56 = vadd.f32 %v1614_v45, %v1613_v55  ;;  %v1389_v55 = vld [vmem:[#allocation3 + $0xf8] sm:$0xff] }
 0x41f   :  { %v1672_v34 = vsel %vm280_vm1, %v1584_v60, 0.0  ;;  %v1585_v26 = vmul.f32 %v1553_v17, %v3145_v35  ;;  %v1588_v40 = vmul.f32 %v1556_v1, %v3105_v52  ;;  %v1558_v44 = vld [vmem:[#allocation5 + $0xb0] sm:$0xff]  ;;  %v1379_v37 = vadd.f32 %v1375_v2, %v1370_v0  ;;  %v1398_v18 = vld [vmem:[#allocation4 + $0xf8] sm:$0xff] }
 0x420   :  { %v1555_v20 = vld [vmem:[#allocation5 + $0x98] sm:$0xff]  ;;  %1406 = vst.msk [vmem:[#allocation5 + $0xf0] sm:$0xff] %vm280_vm1, %v1401_v29  ;;  %v1400_v35 = vadd.f32 %v1396_v16, %v1391_v4  ;;  %v1681_v8 = vsel %vm280_vm1, %v1586_v21, 0.0  ;;  %v1557_v22 = vld [vmem:[#allocation5 + $0xa8] sm:$0xff]  ;;  %v1590_v38 = vmul.f32 %v1558_v44, %v3162_v28  ;;  %v1515_v28 = vpop.permute.xlu0 %1514  ;;  %v1616_v7 = vrot.slane %v1615_v56, 1  ;;  %v1527_v51 = vpop.permute.xlu1 %1526 }
 0x421   :  { %v1673_v23 = vsel %vm280_vm1, %v1585_v26, 0.0  ;;  %v1587_v52 = vmul.f32 %v1555_v20, %v3073_v43  ;;  %1384 = vst.msk [vmem:[#allocation5 + $0xd8] sm:$0xff] %vm280_vm1, %v1379_v37  ;;  %v1690_v15 = vsel %vm280_vm1, %v1588_v40, 0.0  ;;  %v1589_v25 = vmul.f32 %v1557_v22, %v3108_v46  ;;  %v1560_v32 = vld [vmem:[#allocation5 + $0xc0] sm:$0xff] }
 0x422   :  { %v1674_v24 = vadd.f32 %v1673_v23, %v1672_v34  ;;  %1405 = vst.msk [vmem:[#allocation5 + $0xe8] sm:$0xff] %vm280_vm1, %v1400_v35  ;;  %v1393_v31 = vmul.f32 %v1389_v55, %v1379_v37  ;;  %v1592_v9 = vmul.f32 %v1560_v32, %v1507_v57  ;;  %v1785_v46 = vadd.f32 %v3139_v41, %v1608_v42  ;;  %v3347_v23 = vld [vmem:[#allocation35_spill] sm:$0xff] }
 0x423   :  { %v1682_v43 = vsel %vm280_vm1, %v1587_v52, 0.0  ;;  %v1562_v61 = vld [vmem:[#allocation5 + $0xd0] sm:$0xff]  ;;  %v1691_v47 = vsel %vm280_vm1, %v1589_v25, 0.0  ;;  %v1699_v13 = vsel %vm280_vm1, %v1590_v38, 0.0  ;;  %v1619_v0 = vsel %vm280_vm1, %v1573_v33, 0.0 }
 0x424   :  { %v1675_v60 = vrot.slane %v1674_v24, 4  ;;  %v1683_v45 = vadd.f32 %v1682_v43, %v1681_v8  ;;  %v1559_v59 = vld [vmem:[#allocation5 + $0xb8] sm:$0xff]  ;;  %v1402_v62 = vadd.f32 %v1398_v18, %v1393_v31  ;;  %v1692_v27 = vadd.f32 %v1691_v47, %v1690_v15  ;;  %v1561_v21 = vld [vmem:[#allocation5 + $0xc8] sm:$0xff]  ;;  %v1523_v37 = vpop.permute.xlu0 %1522  ;;  %v1542_v25 = vld [vmem:[#allocation5 + $0x30] sm:$0xff] }
 0x425   :  { %v1591_v50 = vmul.f32 %v1559_v59, %v3164_v14  ;;  %v1594_v57 = vmul.f32 %v1562_v61, %v1515_v28  ;;  %v1593_v63 = vmul.f32 %v1561_v21, %v1511_v48  ;;  %v1708_v2 = vsel %vm280_vm1, %v1592_v9, 0.0  ;;  %v1564_v34 = vld [vmem:[#allocation5 + $0xe0] sm:$0xff]  ;;  %v1543_v43 = vld [vmem:[#allocation5 + $0x38] sm:$0xff] }
 0x426   :  { %v1676_v54 = vadd.f32 %v1675_v60, %v1674_v24  ;;  %v1684_v17 = vrot.slane %v1683_v45, 4  ;;  %1407 = vst.msk [vmem:[#allocation5 + $0xf8] sm:$0xff] %vm280_vm1, %v1402_v62  ;;  %v1693_v30 = vrot.slane %v1692_v27, 4  ;;  %v1617_v26 = vadd.f32 %v1616_v7, %v1615_v56  ;;  %v3348_v7 = vld [vmem:[#allocation40_spill] sm:$0xff]  ;;  %v3349_v59 = vld [vmem:[#allocation37_spill] sm:$0xff] }
 0x427   :  { %v1700_v1 = vsel %vm280_vm1, %v1591_v50, 0.0  ;;  %v1709_v14 = vsel %vm280_vm1, %v1593_v63, 0.0  ;;  %v1875_v35 = vmul.f32 %v3347_v23, %v1785_v46  ;;  %v1620_v42 = vadd.f32 %v1619_v0, %v1618_v19  ;;  %v1544_v62 = vld [vmem:[#allocation5 + $0x40] sm:$0xff]  ;;  %v1566_v50 = vld [vmem:[#allocation5 + $0xf0] sm:$0xff] }
 0x428   :  { %v1685_v29 = vadd.f32 %v1684_v17, %v1683_v45  ;;  %v1677_v4 = vrot.slane %v1676_v54, 2  ;;  %v1701_v16 = vadd.f32 %v1700_v1, %v1699_v13  ;;  %v1563_v40 = vld [vmem:[#allocation5 + $0xd8] sm:$0xff]  ;;  %v1694_v44 = vadd.f32 %v1693_v30, %v1692_v27  ;;  %v1545_v27 = vld [vmem:[#allocation5 + $0x48] sm:$0xff] }
 0x429   :  { %v1595_v48 = vmul.f32 %v1563_v40, %v1519_v53  ;;  %v1565_v20 = vld [vmem:[#allocation5 + $0xe8] sm:$0xff]  ;;  %v1717_v52 = vsel %vm280_vm1, %v1594_v57, 0.0  ;;  %v1596_v22 = vmul.f32 %v1564_v34, %v1523_v37  ;;  %v1710_v24 = vadd.f32 %v1709_v14, %v1708_v2  ;;  %v1531_v34 = vpop.permute.xlu0 %1530 }
 0x42a   :  { %v1686_v8 = vrot.slane %v1685_v29, 2  ;;  %v1597_v38 = vmul.f32 %v1565_v20, %v1527_v51  ;;  %v1702_v56 = vrot.slane %v1701_v16, 4  ;;  %v1786_v15 = vadd.f32 %v1755_v11, %v1617_v26  ;;  %v3350_v17 = vld [vmem:[#allocation41_spill] sm:$0xff] }
 0x42b   :  { %v1718_v55 = vsel %vm280_vm1, %v1595_v48, 0.0  ;;  %v1695_v32 = vrot.slane %v1694_v44, 2  ;;  %v1678_v31 = vadd.f32 %v1677_v4, %v1676_v54  ;;  %v1764_v36 = vrot.slane %v3172_v5, 3 }
 0x42c   :  { %v1765_v33 = vrot.slane %v3172_v5, 4  ;;  %v1687_v19 = vadd.f32 %v1686_v8, %v1685_v29  ;;  %v1719_v18 = vadd.f32 %v1718_v55, %v1717_v52  ;;  %v1621_v60 = vrot.slane %v1620_v42, 4  ;;  %v3351_v29 = vld [vmem:[#allocation42_spill] sm:$0xff] }
 0x42d   :  { %v1766_v9 = vrot.slane %v3172_v5, 5  ;;  %v1726_v28 = vsel %vm280_vm1, %v1596_v22, 0.0  ;;  %v1727_v61 = vsel %vm280_vm1, %v1597_v38, 0.0  ;;  %v1891_v53 = vpack.c.bf16 %v1875_v35, %v1875_v35  ;;  %v1567_v20 = vld [vmem:[#allocation5 + $0xf8] sm:$0xff] }
 0x42e   :  { %v1574_v11 = vmul.f32 %v1542_v25, %v3348_v7  ;;  %v1703_v45 = vadd.f32 %v1702_v56, %v1701_v16  ;;  %v1711_v47 = vrot.slane %v1710_v24, 4  ;;  %v1876_v46 = vmul.f32 %v3349_v59, %v1786_v15  ;;  %v3352_v16 = vld [vmem:[#allocation43_spill] sm:$0xff]  ;;  %v1535_v56 = vpop.permute.xlu1 %1534 }
 0x42f   :  { %v1767_v13 = vrot.slane %v3172_v5, 6  ;;  %v1696_v54 = vadd.f32 %v1695_v32, %v1694_v44  ;;  %v1679_v21 = vrot.slane %v1678_v31, 1  ;;  %v1575_v57 = vmul.f32 %v1543_v43, %v3350_v17  ;;  %v1546_v43 = vld [vmem:[#allocation5 + $0x50] sm:$0xff] }
 0x430   :  { %v1768_v63 = vrot.slane %v3172_v5, 7  ;;  %v1688_v0 = vrot.slane %v1687_v19, 1  ;;  %v1720_v30 = vrot.slane %v1719_v18, 4  ;;  %v1728_v2 = vadd.f32 %v1727_v61, %v1726_v28 }
 0x431   :  { %v1622_v1 = vadd.f32 %v1621_v60, %v1620_v42  ;;  %v3227_v26 = vunpack.c.l.b16 %v1891_v53  ;;  %v1576_v4 = vmul.f32 %v1544_v62, %v3351_v29  ;;  %v1577_v14 = vmul.f32 %v1545_v27, %v3352_v16  ;;  %v3353_v62 = vld [vmem:[#allocation44_spill] sm:$0xff] }
 0x432   :  { %v1627_v40 = vsel %vm280_vm1, %v1574_v11, 0.0  ;;  %v1704_v44 = vrot.slane %v1703_v45, 2  ;;  %v1712_v37 = vadd.f32 %v1711_v47, %v1710_v24  ;;  %v1598_v48 = vmul.f32 %v1566_v50, %v1531_v34  ;;  %v1547_v11 = vld [vmem:[#allocation5 + $0x58] sm:$0xff]  ;;  %v1548_v16 = vld [vmem:[#allocation5 + $0x60] sm:$0xff] }
 0x433   :  { %v1892_v51 = vpack.c.bf16 %v1876_v46, %v1876_v46  ;;  %v1697_v23 = vrot.slane %v1696_v54, 1  ;;  %v1680_v35 = vadd.f32 %v1679_v21, %v1678_v31  ;;  %v1623_v8 = vrot.slane %v1622_v1, 2 }
 0x434   :  { %v1628_v52 = vsel %vm280_vm1, %v1575_v57, 0.0  ;;  %v1689_v42 = vadd.f32 %v1688_v0, %v1687_v19  ;;  %v3233_v22 = vadd.f32 %v1720_v30, %v1719_v18  ;;  %v1729_v38 = vrot.slane %v1728_v2, 4  ;;  %v3354_v30 = vld [vmem:[#allocation45_spill] sm:$0xff] }
 0x435   :  { %v1629_v55 = vadd.f32 %v1628_v52, %v1627_v40  ;;  %v1599_v15 = vmul.f32 %v1567_v20, %v1535_v56  ;;  %v1624_v25 = vadd.f32 %v1623_v8, %v1622_v1  ;;  %v1636_v32 = vsel %vm280_vm1, %v1576_v4, 0.0  ;;  %v3355_v20 = vld [vmem:[#allocation34_spill] sm:$0xff]  ;;  %v1850_v52 = vpop.permute.xlu1 %1849 }
 0x436   :  { %v1637_v24 = vsel %vm280_vm1, %v1577_v14, 0.0  ;;  %v1713_v60 = vrot.slane %v1712_v37, 2  ;;  %v1735_v28 = vsel %vm280_vm1, %v1598_v48, 0.0  ;;  %v3238_v31 = vunpack.c.l.b16 %v1892_v51  ;;  %v1549_v14 = vld [vmem:[#allocation5 + $0x68] sm:$0xff] }
 0x437   :  { %v1630_v61 = vrot.slane %v1629_v55, 4  ;;  %v1698_v53 = vadd.f32 %v1697_v23, %v1696_v54  ;;  %v1793_v19 = vadd.f32 %v3172_v5, %v1680_v35  ;;  %v1638_v18 = vadd.f32 %v1637_v24, %v1636_v32  ;;  %v1844_v54 = vpop.permute.xlu0 %1843  ;;  %v3358_v24 = vld [vmem:[#allocation36_spill] sm:$0xff] }
 0x438   :  { %v1705_v7 = vadd.f32 %v1704_v44, %v1703_v45  ;;  %v1794_v47 = vadd.f32 %v1762_v6, %v1689_v42  ;;  %v3243_v59 = vadd.f32 %v1729_v38, %v1728_v2  ;;  %v1578_v27 = vmul.f32 %v1546_v43, %v3353_v62 }
 0x439   :  { %v1631_v46 = vadd.f32 %v1630_v61, %v1629_v55  ;;  %v1722_v50 = vrot.slane %v3233_v22, 2  ;;  %v1736_v21 = vsel %vm280_vm1, %v1599_v15, 0.0  ;;  %v1625_v17 = vrot.slane %v1624_v25, 1  ;;  %v3356_v55 = vld [vmem:[#allocation46_spill] sm:$0xff]  ;;  %v3357_v15 = vld [vmem:[#allocation47_spill] sm:$0xff] }
 0x43a   :  { %v1639_v57 = vrot.slane %v1638_v18, 4  ;;  %v1951_v0 = vrot.slane %v3238_v31, 7  ;;  %v1579_v1 = vmul.f32 %v1547_v11, %v3354_v30  ;;  %v1645_v6 = vsel %vm280_vm1, %v1578_v27, 0.0 }
 0x43b   :  { %v1632_v45 = vrot.slane %v1631_v46, 2  ;;  %v1795_v2 = vadd.f32 %v1763_v12, %v1698_v53  ;;  %v1883_v34 = vmul.f32 %v1844_v54, %v1793_v19  ;;  %v1706_v4 = vrot.slane %v1705_v7, 1 }
 0x43c   :  { %v1640_v29 = vadd.f32 %v1639_v57, %v1638_v18  ;;  %v1737_v40 = vadd.f32 %v1736_v21, %v1735_v28  ;;  %v1646_v48 = vsel %vm280_vm1, %v1579_v1, 0.0  ;;  %v1714_v51 = vadd.f32 %v1713_v60, %v1712_v37 }
 0x43d   :  { %v1633_v44 = vadd.f32 %v1632_v45, %v1631_v46  ;;  %v1884_v23 = vmul.f32 %v3355_v20, %v1794_v47  ;;  %v1626_v35 = vadd.f32 %v1625_v17, %v1624_v25  ;;  %v1647_v42 = vadd.f32 %v1646_v48, %v1645_v6  ;;  %v1852_v45 = vpop.permute.xlu1 %1851  ;;  %v1551_v48 = vld [vmem:[#allocation5 + $0x78] sm:$0xff] }
 0x43e   :  { %v1641_v8 = vrot.slane %v1640_v29, 2  ;;  %v1715_v56 = vrot.slane %v1714_v51, 1  ;;  %v1580_v12 = vmul.f32 %v1548_v16, %v3356_v55  ;;  %v1581_v32 = vmul.f32 %v1549_v14, %v3357_v15  ;;  %v3359_v16 = vld [vmem:[#allocation38_spill] sm:$0xff]  ;;  %v3362_v15 = vld [vmem:[#allocation49_spill] sm:$0xff] }
 0x43f   :  { %v1634_v38 = vrot.slane %v1633_v44, 1  ;;  %v1885_v43 = vmul.f32 %v3358_v24, %v1795_v2  ;;  %v1707_v28 = vadd.f32 %v1706_v4, %v1705_v7  ;;  %v1648_v61 = vrot.slane %v1647_v42, 4  ;;  %v1836_v4 = vpop.permute.xlu0 %1835 }
 0x440   :  { %v1642_v31 = vadd.f32 %v1641_v8, %v1640_v29  ;;  %v1731_v53 = vrot.slane %v3243_v59, 2  ;;  %v1738_v37 = vrot.slane %v1737_v40, 4  ;;  %v1654_v60 = vsel %vm280_vm1, %v1580_v12, 0.0 }
 0x441   :  { %v1655_v25 = vsel %vm280_vm1, %v1581_v32, 0.0  ;;  %v1899_v19 = vpack.c.bf16 %v1883_v34, %v1883_v34  ;;  %v1635_v18 = vadd.f32 %v1634_v38, %v1633_v44  ;;  %v1649_v47 = vadd.f32 %v1648_v61, %v1647_v42  ;;  %v1550_v34 = vld [vmem:[#allocation5 + $0x70] sm:$0xff]  ;;  %v3361_v38 = vld [vmem:[#allocation33_spill] sm:$0xff]  ;;  %v1854_v12 = vpop.permute.xlu1 %1853 }
 0x442   :  { %v1643_v11 = vrot.slane %v1642_v31, 1  ;;  %v1787_v46 = vadd.f32 %v1756_v49, %v1626_v35  ;;  %v1716_v62 = vadd.f32 %v1715_v56, %v1714_v51  ;;  %v1656_v27 = vadd.f32 %v1655_v25, %v1654_v60  ;;  %v3360_v35 = vld [vmem:[#allocation48_spill] sm:$0xff] }
 0x443   :  { %v1723_v21 = vadd.f32 %v1722_v50, %v3233_v22  ;;  %v1900_v7 = vpack.c.bf16 %v1884_v23, %v1884_v23  ;;  %v1901_v17 = vpack.c.bf16 %v1885_v43, %v1885_v43  ;;  %v1796_v57 = vadd.f32 %v1764_v36, %v1707_v28  ;;  %v1838_v61 = vpop.permute.xlu0 %1837 }
 0x444   :  { %v1650_v54 = vrot.slane %v1649_v47, 2  ;;  %v1739_v30 = vadd.f32 %v1738_v37, %v1737_v40  ;;  %v1644_v1 = vadd.f32 %v1643_v11, %v1642_v31  ;;  %v1657_v6 = vrot.slane %v1656_v27, 4 }
 0x445   :  { %v1724_v2 = vrot.slane %v1723_v21, 1  ;;  %v1943_v29 = vunpack.c.l.b16 %v1899_v19  ;;  %v3268_v49 = vsel %vm1952_vm4, %v1951_v0, %v3227_v26  ;;  %v1788_v22 = vadd.f32 %v1757_v3, %v1635_v18 }
 0x446   :  { %v1651_v50 = vadd.f32 %v1650_v54, %v1649_v47  ;;  %v1877_v14 = vmul.f32 %v3359_v16, %v1787_v46  ;;  %v1797_v36 = vadd.f32 %v1765_v33, %v1716_v62  ;;  %v1658_v40 = vadd.f32 %v1657_v6, %v1656_v27 }
 0x447   :  { %v1725_v44 = vadd.f32 %v1724_v2, %v1723_v21  ;;  %v1944_v51 = vunpack.c.l.b16 %v1900_v7  ;;  %v1886_v20 = vmul.f32 %v1850_v52, %v1796_v57  ;;  %v1582_v8 = vmul.f32 %v1550_v34, %v3360_v35 }
 0x448   :  { %v1652_v23 = vrot.slane %v1651_v50, 1  ;;  %v1945_v26 = vunpack.c.l.b16 %v1901_v17  ;;  %v1740_v0 = vrot.slane %v1739_v30, 2  ;;  %v1789_v42 = vadd.f32 %v1758_v39, %v1644_v1 }
 0x449   :  { %v1659_v3 = vrot.slane %v1658_v40, 2  ;;  %v1878_v56 = vmul.f32 %v3361_v38, %v1788_v22  ;;  %v1798_v33 = vadd.f32 %v1766_v9, %v1725_v44  ;;  %v1583_v32 = vmul.f32 %v1551_v48, %v3362_v15 }
 0x44a   :  { %v1653_v55 = vadd.f32 %v1652_v23, %v1651_v50  ;;  %v1893_v24 = vpack.c.bf16 %v1877_v14, %v1877_v14  ;;  %v1887_v52 = vmul.f32 %v1852_v45, %v1797_v36  ;;  %v1663_v31 = vsel %vm280_vm1, %v1582_v8, 0.0 }
 0x44b   :  { %v1660_v43 = vadd.f32 %v1659_v3, %v1658_v40  ;;  %v1902_v28 = vpack.c.bf16 %v1886_v20, %v1886_v20  ;;  %v1664_v37 = vsel %vm280_vm1, %v1583_v32, 0.0  ;;  %v1732_v60 = vadd.f32 %v1731_v53, %v3243_v59 }
 0x44c   :  { %v1790_v39 = vadd.f32 %v1759_v58, %v1653_v55  ;;  %v1972_v25 = vrot.slane %v1944_v51, 7  ;;  %v1974_v19 = vrot.slane %v1945_v26, 6  ;;  %v1879_v9 = vmul.f32 %v1836_v4, %v1789_v42  ;;  %v1856_v58 = vpop.permute.xlu1 %1855  ;;  %v1840_v4 = vpop.permute.xlu0 %1839 }
 0x44d   :  { %v1661_v18 = vrot.slane %v1660_v43, 1  ;;  %v1894_v11 = vpack.c.bf16 %v1878_v56, %v1878_v56  ;;  %v1888_v47 = vmul.f32 %v1854_v12, %v1798_v33  ;;  %v1665_v46 = vadd.f32 %v1664_v37, %v1663_v31 }
 0x44e   :  { %v1733_v62 = vrot.slane %v1732_v60, 1  ;;  %v1937_v27 = vunpack.c.l.b16 %v1893_v24  ;;  %v1903_v21 = vpack.c.bf16 %v1887_v52, %v1887_v52  ;;  %v1741_v17 = vadd.f32 %v1740_v0, %v1739_v30 }
 0x44f   :  { %v1662_v7 = vadd.f32 %v1661_v18, %v1660_v43  ;;  %v1946_v57 = vunpack.c.l.b16 %v1902_v28  ;;  %v1880_v54 = vmul.f32 %v1838_v61, %v1790_v39  ;;  %v1666_v45 = vrot.slane %v1665_v46, 4 }
 0x450   :  { %v1734_v1 = vadd.f32 %v1733_v62, %v1732_v60  ;;  %v1973_v6 = vsel %vm1952_vm4, %v1972_v25, %v1943_v29  ;;  %v1895_v59 = vpack.c.bf16 %v1879_v9, %v1879_v9  ;;  %v1742_v2 = vrot.slane %v1741_v17, 1  ;;  %v1842_v60 = vpop.permute.xlu0 %1841 }
 0x451   :  { %v1791_v53 = vadd.f32 %v1760_v10, %v1662_v7  ;;  %v1938_v34 = vunpack.c.l.b16 %v1894_v11  ;;  %v1904_v22 = vpack.c.bf16 %v1888_v47, %v1888_v47  ;;  %v1667_v50 = vadd.f32 %v1666_v45, %v1665_v46  ;;  %v3363_v45 = vld [vmem:[#allocation31_spill] sm:$0xff] }
 0x452   :  { %v1799_v16 = vadd.f32 %v1767_v13, %v1734_v1  ;;  %v1954_v30 = vrot.slane %v1937_v27, 6  ;;  %v1947_v14 = vunpack.c.l.b16 %v1903_v21  ;;  %v1743_v40 = vadd.f32 %v1742_v2, %v1741_v17  ;;  %v1858_v13 = vpop.permute.xlu1 %1857 }
 0x453   :  { %v1881_v36 = vmul.f32 %v1840_v4, %v1791_v53  ;;  %v1976_v44 = vrot.slane %v1946_v57, 5  ;;  %v1896_v48 = vpack.c.bf16 %v1880_v54, %v1880_v54  ;;  %v1668_v51 = vrot.slane %v1667_v50, 2 }
 0x454   :  { %v1889_v29 = vmul.f32 %v1856_v58, %v1799_v16  ;;  %v1975_v20 = vsel %vm1955_vm5, %v1974_v19, %v1973_v6  ;;  %v1939_v10 = vunpack.c.l.b16 %v1895_v59  ;;  %v1800_v23 = vadd.f32 %v1768_v63, %v1743_v40  ;;  %v3364_v59 = vld [vmem:[#allocation32_spill] sm:$0xff] }
 0x455   :  { %v1957_v35 = vrot.slane %v1938_v34, 5  ;;  %v1948_v8 = vunpack.c.l.b16 %v1904_v22  ;;  %v1669_v26 = vadd.f32 %v1668_v51, %v1667_v50  ;;  %v1956_v42 = vsel %vm1955_vm5, %v1954_v30, %v3268_v49 }
 0x456   :  { %v1905_v0 = vpack.c.bf16 %v1889_v29, %v1889_v29  ;;  %v1978_v3 = vrot.slane %v1947_v14, 4  ;;  %v1897_v38 = vpack.c.bf16 %v1881_v36, %v1881_v36  ;;  %v1890_v56 = vmul.f32 %v1858_v13, %v1800_v23 }
 0x457   :  { %v1977_v55 = vsel %vm1958_vm6, %v1976_v44, %v1975_v20  ;;  %v1940_v12 = vunpack.c.l.b16 %v1896_v48  ;;  %v1670_v33 = vrot.slane %v1669_v26, 1  ;;  %v1960_v15 = vrot.slane %v1939_v10, 4 }
 0x458   :  { %v1761_v32 = vrot.slane %v3139_v41, 7  ;;  %v1949_v5 = vunpack.c.l.b16 %v1905_v0  ;;  %v1906_v63 = vpack.c.bf16 %v1890_v56, %v1890_v56  ;;  %v1959_v24 = vsel %vm1958_vm6, %v1957_v35, %v1956_v42 }
 0x459   :  { %v1980_v52 = vrot.slane %v1948_v8, 3  ;;  %v1671_v43 = vadd.f32 %v1670_v33, %v1669_v26  ;;  %v1979_v31 = vsel %vm1961_vm7, %v1978_v3, %v1977_v55  ;;  %v1941_v28 = vunpack.c.l.b16 %v1897_v38 }
 0x45a   :  { %v1963_v49 = vrot.slane %v1940_v12, 3  ;;  %v1950_v39 = vunpack.c.l.b16 %v1906_v63  ;;  %v1962_v37 = vsel %vm1961_vm7, %v1960_v15, %v1959_v24  ;;  %v1982_v25 = vrot.slane %v1949_v5, 2 }
 0x45b   :  { %v1792_v61 = vadd.f32 %v1761_v32, %v1671_v43  ;;  %v1981_v19 = vsel %vm1964_vm8, %v1980_v52, %v1979_v31  ;;  %v1966_v18 = vrot.slane %v1941_v28, 2 }
 0x45c   :  { %v1965_v41 = vsel %vm1964_vm8, %v1963_v49, %v1962_v37  ;;  %v1984_v47 = vrot.slane %v1950_v39, 1  ;;  %v1983_v46 = vsel %vm1967_vm9, %v1982_v25, %v1981_v19 }
 0x45d   :  { %v1882_v9 = vmul.f32 %v1842_v60, %v1792_v61  ;;  %v1968_v27 = vsel %vm1967_vm9, %v1966_v18, %v1965_v41 }
 0x45e   :  { %v1985_v7 = vsel %vm1970_vm10, %v1984_v47, %v1983_v46 }
 0x45f   :  { %v1898_v11 = vpack.c.bf16 %v1882_v9, %v1882_v9 }
 0x461   :  { %v1942_v62 = vunpack.c.l.b16 %v1898_v11 }
 0x463   :  { %v1969_v21 = vrot.slane %v1942_v62, 1 }
 0x465   :  { %v1971_v17 = vsel %vm1970_vm10, %v1969_v21, %v1968_v27 }
 0x466   :  { %v1986_v57 = vpack.c.b16 %v1985_v7, %v1971_v17 }
 0x468   :  { %2133 = vmatmul.mubr.msk.bf16.vlgmr.msra.gmra.mxu1 %vm280_vm1, %v1986_v57 }
 0x528   :  { %v2024_v54 = vpop.f32.mrf.mxu1 }
 0x529   :  { %v2031_v58 = vadd.f32 %v2024_v54, %v3363_v45 }
 0x52a   :  { %v2134_v1 = vpop.f32.mrf.mxu1 }
 0x52b   :  { %2033 = vst [vmem:[#allocation23] sm:$0xff] %v2031_v58 }
 0x52c   :  { %v2027_v6 = vpop.f32.mrf.mxu1 }
 0x52d   :  { %v2032_v53 = vadd.f32 %v2027_v6, %v3364_v59 }
 0x52e   :  { %v2135_v2 = vpop.f32.mrf.mxu1 }
 0x52f   :  { %2034 = vst [vmem:[#allocation23 + $0x8] sm:$0xff] %v2032_v53 }
 0x530   :  { %2452 = shalt.err (!%p2449_p12)
}
 0x531   :  { %2046 = dma.vmem_to_hbm [thread:$0]  %s2041_s18, 256, %s3321_s12, [#allocation8], %s2478_s14, %s2478_s14, %s2479_s15  }
 0x532   :  { %2473 = dma.done.wait [#allocation8], 256  }
 0x533   :  { %2474 = vsyncadd [#allocation8], 4294967040 }
 0x534   :  { %2050 = vsyncpa [#allocation7], 1 }
 0x535   :  { %2051 = vsyncpa [#allocation10], 1 }
 0x536   :  { %2052 = vsyncpa [#allocation13], 1 }
 0x537   :  { %2053 = vsyncpa [#allocation16], 1 }
 0x538   :  { %2054 = vsyncpa [#allocation19], 1 }
 0x539   :  { %2055 = vsyncpa [#allocation22], 1 }
 0x53a   :  { %2056 = vsyncpa [#allocation8], 1 }

</bundles_post_ra>
